<compile_context>
chip_gen: v5e
topology: v5e:2x2
jax: 0.10.0
libtpu: 0.0.40
codegen_flags: <defaults>
</compile_context>

<pallas_src>
import functools
import math

import jax
import jax.numpy as jnp
import numpy as np
from jax.experimental import pallas as pl
from jax.experimental.pallas import tpu as pltpu

LANE = 128


def _round_up(x, m):
    return (x + m - 1) // m * m


def _pad_last(a, n_pad):
    pad = n_pad - a.shape[-1]
    if pad == 0:
        return a
    widths = [(0, 0)] * (a.ndim - 1) + [(0, pad)]
    return jnp.pad(a, widths)


# -------------------- static pooling / interpolation matrices ---------------- #
def adaptive_pool_matrix(out_size, in_size):
    """(out_size, in_size): exact PyTorch AdaptiveAvgPool2d bin averaging."""
    m = np.zeros((out_size, in_size), np.float32)
    for i in range(out_size):
        lo = int(math.floor(i * in_size / out_size))
        hi = int(math.ceil((i + 1) * in_size / out_size))
        m[i, lo:hi] = 1.0 / (hi - lo)
    return m


def bilinear_matrix(out_size, in_size):
    """(out_size, in_size): bilinear interpolation, align_corners=True."""
    m = np.zeros((out_size, in_size), np.float32)
    if in_size == 1:
        m[:, 0] = 1.0
        return m
    for i in range(out_size):
        src = i * (in_size - 1) / (out_size - 1) if out_size > 1 else 0.0
        lo = min(int(math.floor(src)), in_size - 2)
        frac = src - lo
        m[i, lo] += 1.0 - frac
        m[i, lo + 1] += frac
    return m


def build_kron_matrices(sizes, h, w):
    """Stacked Kronecker pooling (S, s2p, H*W) and interp (S, H*W, s2p) matrices."""
    smax = max(sizes)
    s2_pad = _round_up(smax * smax, 8)       # sublane-aligned stage grid rows
    pk, lk = [], []
    for s in sizes:
        ph = np.zeros((smax, h), np.float32)
        pw = np.zeros((smax, w), np.float32)
        ph[:s] = adaptive_pool_matrix(s, h)
        pw[:s] = adaptive_pool_matrix(s, w)
        lh = np.zeros((h, smax), np.float32)
        lw = np.zeros((w, smax), np.float32)
        lh[:, :s] = bilinear_matrix(h, s)
        lw[:, :s] = bilinear_matrix(w, s)
        pk_s = np.zeros((s2_pad, h * w), np.float32)
        lk_s = np.zeros((h * w, s2_pad), np.float32)
        pk_s[: smax * smax] = np.kron(ph, pw)        # pooled[i*smax+j] = Ph[i]Pw[j] x
        lk_s[:, : smax * smax] = np.kron(lh, lw)     # prior[h*W+w] = Lh[h]Lw[w] Y
        pk.append(pk_s)
        lk.append(lk_s)
    return np.stack(pk), np.stack(lk), s2_pad


def fold_bn(gamma, beta, mean, var, eps=1e-5):
    scale = gamma / jnp.sqrt(var + eps)
    shift = beta - mean * scale
    return scale, shift


# ------------------------------- Pallas kernel ------------------------------- #
def psp_fused_kernel(x_ref, pk_ref, w_st_ref, sc_st_ref, sh_st_ref,
                     lk_ref, w_p_ref, w_f_ref, b_sc_ref, b_sh_ref, o_ref,
                     *, num_stages):
    # x_ref:    (1, HW, C_in)  f32          pk_ref: (S, S2P, HW)   f32
    # w_st_ref: (S, C_in, C_out) bf16       sc/sh_st: (S, 1, C_out) f32
    # lk_ref:   (S, HW, S2P)  f32           w_p_ref: (S, C_out, N_pad) bf16
    # w_f_ref:  (C_in, N_pad) bf16          b_sc/b_sh: (1, N_pad)  f32
    # o_ref:    (1, HW, N_pad) f32
    x = x_ref[0]                                            # (HW, C_in) f32
    x_bf = x.astype(jnp.bfloat16)

    # bottleneck contribution of the raw feats (last chunk of the concat)
    acc = jnp.dot(x_bf, w_f_ref[...], preferred_element_type=jnp.float32)

    for s in range(num_stages):                             # static unroll
        # adaptive average pool (Kronecker pooling matrix), f32
        pooled = jnp.dot(pk_ref[s], x, preferred_element_type=jnp.float32)
        # 1x1 conv + folded BN of the stage
        y = jnp.dot(pooled.astype(jnp.bfloat16), w_st_ref[s],
                    preferred_element_type=jnp.float32)
        y = y * sc_st_ref[s] + sh_st_ref[s]                 # padded rows -> shift junk
        # bilinear upsample (zero cols of lk kill padded-row junk), f32
        prior = jnp.dot(lk_ref[s], y, preferred_element_type=jnp.float32)
        # bottleneck split-K accumulation for this prior chunk
        acc = acc + jnp.dot(prior.astype(jnp.bfloat16), w_p_ref[s],
                            preferred_element_type=jnp.float32)

    out = acc * b_sc_ref[...] + b_sh_ref[...]               # folded BN, f32
    o_ref[0] = jnp.maximum(out, 0.0).astype(o_ref.dtype)    # ReLU, lane-dense store


# ------------------------------ Pallas wrapper ------------------------------- #
def psp_pallas(x2d, pk, w_st, sc_st, sh_st, lk, w_p, w_f, b_sc, b_sh):
    n, hw, c_in = x2d.shape
    num_stages, s2_pad, _ = pk.shape
    c_out = w_st.shape[-1]
    n_pad = w_f.shape[-1]

    kernel = functools.partial(psp_fused_kernel, num_stages=num_stages)

    flops = 2 * n * (
        hw * c_in * n_pad
        + num_stages * (s2_pad * hw * c_in + s2_pad * c_in * c_out
                        + hw * s2_pad * c_out + hw * c_out * n_pad))
    bytes_accessed = int(
        sum(a.size * a.dtype.itemsize
            for a in (x2d, pk, w_st, sc_st, sh_st, lk, w_p, w_f, b_sc, b_sh))
        + n * hw * n_pad * 4)

    return pl.pallas_call(
        kernel,
        out_shape=jax.ShapeDtypeStruct((n, hw, n_pad), jnp.float32),
        grid=(n,),
        in_specs=[
            pl.BlockSpec((1, hw, c_in), lambda b: (b, 0, 0)),
            pl.BlockSpec((num_stages, s2_pad, hw), lambda b: (0, 0, 0)),
            pl.BlockSpec((num_stages, c_in, c_out), lambda b: (0, 0, 0)),
            pl.BlockSpec((num_stages, 1, c_out), lambda b: (0, 0, 0)),
            pl.BlockSpec((num_stages, 1, c_out), lambda b: (0, 0, 0)),
            pl.BlockSpec((num_stages, hw, s2_pad), lambda b: (0, 0, 0)),
            pl.BlockSpec((num_stages, c_out, n_pad), lambda b: (0, 0, 0)),
            pl.BlockSpec((c_in, n_pad), lambda b: (0, 0)),
            pl.BlockSpec((1, n_pad), lambda b: (0, 0)),
            pl.BlockSpec((1, n_pad), lambda b: (0, 0)),
        ],
        out_specs=pl.BlockSpec((1, hw, n_pad), lambda b: (b, 0, 0)),
        compiler_params=pltpu.CompilerParams(
            dimension_semantics=("parallel",),
            vmem_limit_bytes=32 * 1024 * 1024,
        ),
        cost_estimate=pl.CostEstimate(
            flops=flops, transcendentals=0, bytes_accessed=bytes_accessed),
    )(x2d, pk, w_st, sc_st, sh_st, lk, w_p, w_f, b_sc, b_sh)


# --------------------------------- Forward ----------------------------------- #
def psp_forward(feats, params, sizes, *, use_pallas=True,
                compute_dtype=jnp.bfloat16):
    # feats: (N, H, W, C_in)   (PyTorch reference is NCHW; we use NHWC)
    n, h, w_, c_in = feats.shape
    num_stages = len(sizes)
    c_out = params["stages"][0]["w"].shape[-1]
    n_pad = _round_up(c_out, LANE)
    hw = h * w_

    # static pooling / interpolation Kronecker matrices (numpy, one-time)
    pk_np, lk_np, _ = build_kron_matrices(sizes, h, w_)
    pk = jnp.asarray(pk_np)                                 # (S, S2P, HW)  f32
    lk = jnp.asarray(lk_np)                                 # (S, HW, S2P)  f32

    # stage conv weights + folded BN
    w_st = jnp.stack([p["w"] for p in params["stages"]]).astype(compute_dtype)
    scs, shs = [], []
    for p in params["stages"]:
        sc, sh = fold_bn(p["gamma"], p["beta"], p["mean"], p["var"])
        scs.append(sc)
        shs.append(sh)
    sc_st = jnp.stack(scs)[:, None, :]                      # (S, 1, C_out) f32
    sh_st = jnp.stack(shs)[:, None, :]

    # bottleneck weights split to match torch.cat([prior_0..prior_{S-1}, feats], 1)
    b = params["bottleneck"]
    w_cat = b["w"]                                          # (C_in + S*C_out, C_out)
    w_p = _pad_last(
        w_cat[: num_stages * c_out].reshape(num_stages, c_out, c_out),
        n_pad).astype(compute_dtype)                        # (S, C_out, N_pad)
    w_f = _pad_last(w_cat[num_stages * c_out:], n_pad).astype(compute_dtype)
    b_sc, b_sh = fold_bn(b["gamma"], b["beta"], b["mean"], b["var"])
    b_sc = _pad_last(b_sc, n_pad)[None, :]
    b_sh = _pad_last(b_sh, n_pad)[None, :]

    x2d = feats.reshape(n, hw, c_in)                        # f32

    if use_pallas:
        out = psp_pallas(x2d, pk, w_st, sc_st, sh_st, lk, w_p, w_f, b_sc, b_sh)
    else:
        # Plain-JAX reference with identical math (same casts / accumulation).
        outs = []
        for bi in range(n):
            x = x2d[bi]
            x_bf = x.astype(compute_dtype)
            acc = jnp.dot(x_bf, w_f, preferred_element_type=jnp.float32)
            for s in range(num_stages):
                pooled = jnp.dot(pk[s], x, preferred_element_type=jnp.float32)
                y = jnp.dot(pooled.astype(compute_dtype), w_st[s],
                            preferred_element_type=jnp.float32)
                y = y * sc_st[s] + sh_st[s]
                prior = jnp.dot(lk[s], y, preferred_element_type=jnp.float32)
                acc = acc + jnp.dot(prior.astype(compute_dtype), w_p[s],
                                    preferred_element_type=jnp.float32)
            outs.append(jnp.maximum(acc * b_sc + b_sh, 0.0))
        out = jnp.stack(outs)

    return out[:, :, :c_out].reshape(n, h, w_, c_out)


def init_params(key, c_in, c_out, sizes):
    keys = jax.random.split(key, len(sizes) + 1)

    def bn_and_conv(k, k_in):
        kk = jax.random.split(k, 5)
        return dict(
            w=jax.random.normal(kk[0], (k_in, c_out), jnp.float32) * 0.1,
            gamma=jax.random.uniform(kk[1], (c_out,), jnp.float32, minval=0.5, maxval=1.5),
            beta=jax.random.normal(kk[2], (c_out,), jnp.float32) * 0.1,
            mean=jax.random.normal(kk[3], (c_out,), jnp.float32) * 0.1,
            var=jax.random.uniform(kk[4], (c_out,), jnp.float32, minval=0.5, maxval=1.5),
        )

    stages = [bn_and_conv(keys[i], c_in) for i in range(len(sizes))]
    c_cat = c_in + len(sizes) * c_out
    bottleneck = bn_and_conv(keys[-1], c_cat)
    bottleneck["w"] = bottleneck["w"] * 0.5  # keep magnitudes modest
    return dict(stages=stages, bottleneck=bottleneck)


if __name__ == "__main__":
    key = jax.random.PRNGKey(0)
    k_x, k_p = jax.random.split(key)

    N, C_IN, H, W = 2, 16, 16, 16   # NHWC input (PyTorch NCHW equivalent: (2, 16, 16, 16))
    C_OUT = 32
    SIZES = (1, 2, 3, 6)

    feats = jax.random.normal(k_x, (N, H, W, C_IN), jnp.float32)
    params = init_params(k_p, C_IN, C_OUT, SIZES)

    out = psp_forward(feats, params, SIZES, use_pallas=True)
    out = jax.block_until_ready(out)

    ref = psp_forward(feats, params, SIZES, use_pallas=False)
    ref = jax.block_until_ready(ref)

    assert out.shape == (N, H, W, C_OUT), out.shape
    assert bool(jnp.allclose(out, ref, rtol=2e-3, atol=2e-3)), \
        "kernel mismatch vs JAX reference"

    print("KERNEL_OK")
</pallas_src>

<mosaic_0001>
module attributes {stable_mosaic.version = 11 : i64} {
  func.func @psp_fused_kernel(%arg0: i32, %arg1: memref<1x256x16xf32, #tpu.memory_space<vmem>>, %arg2: memref<4x40x256xf32, #tpu.memory_space<vmem>>, %arg3: memref<4x16x32xbf16, #tpu.memory_space<vmem>>, %arg4: memref<4x1x32xf32, #tpu.memory_space<vmem>>, %arg5: memref<4x1x32xf32, #tpu.memory_space<vmem>>, %arg6: memref<4x256x40xf32, #tpu.memory_space<vmem>>, %arg7: memref<4x32x128xbf16, #tpu.memory_space<vmem>>, %arg8: memref<16x128xbf16, #tpu.memory_space<vmem>>, %arg9: memref<1x128xf32, #tpu.memory_space<vmem>>, %arg10: memref<1x128xf32, #tpu.memory_space<vmem>>, %arg11: memref<1x256x128xf32, #tpu.memory_space<vmem>>) attributes {dimension_semantics = [#tpu.dimension_semantics<parallel>], iteration_bounds = array<i64: 2>, scalar_prefetch = 0 : i64, scratch_operands = 0 : i64, tpu.core_type = #tpu.core_type<tc>, window_params = [{transform_indices = @transform_0, window_bounds = array<i64: 1, 256, 16>}, {pipeline_mode = #tpu.pipeline_mode<synchronous>, transform_indices = @transform_1, window_bounds = array<i64: 4, 40, 256>}, {pipeline_mode = #tpu.pipeline_mode<synchronous>, transform_indices = @transform_2, window_bounds = array<i64: 4, 16, 32>}, {pipeline_mode = #tpu.pipeline_mode<synchronous>, transform_indices = @transform_3, window_bounds = array<i64: 4, 1, 32>}, {pipeline_mode = #tpu.pipeline_mode<synchronous>, transform_indices = @transform_4, window_bounds = array<i64: 4, 1, 32>}, {pipeline_mode = #tpu.pipeline_mode<synchronous>, transform_indices = @transform_5, window_bounds = array<i64: 4, 256, 40>}, {pipeline_mode = #tpu.pipeline_mode<synchronous>, transform_indices = @transform_6, window_bounds = array<i64: 4, 32, 128>}, {pipeline_mode = #tpu.pipeline_mode<synchronous>, transform_indices = @transform_7, window_bounds = array<i64: 16, 128>}, {pipeline_mode = #tpu.pipeline_mode<synchronous>, transform_indices = @transform_8, window_bounds = array<i64: 1, 128>}, {pipeline_mode = #tpu.pipeline_mode<synchronous>, transform_indices = @transform_9, window_bounds = array<i64: 1, 128>}, {transform_indices = @transform_10, window_bounds = array<i64: 1, 256, 128>}]} {
    %c0 = arith.constant 0 : index
    %c0_0 = arith.constant 0 : index
    %c0_1 = arith.constant 0 : index
    %0 = vector.load %arg1[%c0, %c0_0, %c0_1] : memref<1x256x16xf32, #tpu.memory_space<vmem>>, vector<1x256x16xf32>
    %1 = vector.shape_cast %0 : vector<1x256x16xf32> to vector<256x16xf32>
    %2 = arith.truncf %1 : vector<256x16xf32> to vector<256x16xbf16>
    %c0_2 = arith.constant 0 : index
    %c0_3 = arith.constant 0 : index
    %3 = vector.load %arg8[%c0_2, %c0_3] : memref<16x128xbf16, #tpu.memory_space<vmem>>, vector<16x128xbf16>
    %cst = arith.constant dense<0.000000e+00> : vector<256x128xf32>
    %4 = tpu.matmul %2, %3, %cst {dimension_numbers = #tpu.dot_dimension_numbers<[1], [0], [0], [1], [0, 0, 1, 1], [], []>} : vector<256x16xbf16>, vector<16x128xbf16>, vector<256x128xf32> -> vector<256x128xf32>
    %c0_4 = arith.constant 0 : index
    %c0_5 = arith.constant 0 : index
    %c0_6 = arith.constant 0 : index
    %5 = vector.load %arg2[%c0_4, %c0_5, %c0_6] : memref<4x40x256xf32, #tpu.memory_space<vmem>>, vector<1x40x256xf32>
    %6 = vector.shape_cast %5 : vector<1x40x256xf32> to vector<40x256xf32>
    %cst_7 = arith.constant dense<0.000000e+00> : vector<40x16xf32>
    %7 = tpu.matmul %6, %1, %cst_7 {dimension_numbers = #tpu.dot_dimension_numbers<[1], [0], [0], [1], [0, 0, 1, 1], [], []>} : vector<40x256xf32>, vector<256x16xf32>, vector<40x16xf32> -> vector<40x16xf32>
    %8 = arith.truncf %7 : vector<40x16xf32> to vector<40x16xbf16>
    %c0_8 = arith.constant 0 : index
    %c0_9 = arith.constant 0 : index
    %c0_10 = arith.constant 0 : index
    %9 = vector.load %arg3[%c0_8, %c0_9, %c0_10] : memref<4x16x32xbf16, #tpu.memory_space<vmem>>, vector<1x16x32xbf16>
    %10 = vector.shape_cast %9 : vector<1x16x32xbf16> to vector<16x32xbf16>
    %cst_11 = arith.constant dense<0.000000e+00> : vector<40x32xf32>
    %11 = tpu.matmul %8, %10, %cst_11 {dimension_numbers = #tpu.dot_dimension_numbers<[1], [0], [0], [1], [0, 0, 1, 1], [], []>} : vector<40x16xbf16>, vector<16x32xbf16>, vector<40x32xf32> -> vector<40x32xf32>
    %c0_12 = arith.constant 0 : index
    %c0_13 = arith.constant 0 : index
    %c0_14 = arith.constant 0 : index
    %12 = vector.load %arg4[%c0_12, %c0_13, %c0_14] : memref<4x1x32xf32, #tpu.memory_space<vmem>>, vector<1x1x32xf32>
    %13 = vector.shape_cast %12 : vector<1x1x32xf32> to vector<1x32xf32>
    %14 = vector.broadcast %13 : vector<1x32xf32> to vector<40x32xf32>
    %15 = arith.mulf %11, %14 : vector<40x32xf32>
    %c0_15 = arith.constant 0 : index
    %c0_16 = arith.constant 0 : index
    %c0_17 = arith.constant 0 : index
    %16 = vector.load %arg5[%c0_15, %c0_16, %c0_17] : memref<4x1x32xf32, #tpu.memory_space<vmem>>, vector<1x1x32xf32>
    %17 = vector.shape_cast %16 : vector<1x1x32xf32> to vector<1x32xf32>
    %18 = vector.broadcast %17 : vector<1x32xf32> to vector<40x32xf32>
    %19 = arith.addf %15, %18 : vector<40x32xf32>
    %c0_18 = arith.constant 0 : index
    %c0_19 = arith.constant 0 : index
    %c0_20 = arith.constant 0 : index
    %20 = vector.load %arg6[%c0_18, %c0_19, %c0_20] : memref<4x256x40xf32, #tpu.memory_space<vmem>>, vector<1x256x40xf32>
    %21 = vector.shape_cast %20 : vector<1x256x40xf32> to vector<256x40xf32>
    %cst_21 = arith.constant dense<0.000000e+00> : vector<256x32xf32>
    %22 = tpu.matmul %21, %19, %cst_21 {dimension_numbers = #tpu.dot_dimension_numbers<[1], [0], [0], [1], [0, 0, 1, 1], [], []>} : vector<256x40xf32>, vector<40x32xf32>, vector<256x32xf32> -> vector<256x32xf32>
    %23 = arith.truncf %22 : vector<256x32xf32> to vector<256x32xbf16>
    %c0_22 = arith.constant 0 : index
    %c0_23 = arith.constant 0 : index
    %c0_24 = arith.constant 0 : index
    %24 = vector.load %arg7[%c0_22, %c0_23, %c0_24] : memref<4x32x128xbf16, #tpu.memory_space<vmem>>, vector<1x32x128xbf16>
    %25 = vector.shape_cast %24 : vector<1x32x128xbf16> to vector<32x128xbf16>
    %cst_25 = arith.constant dense<0.000000e+00> : vector<256x128xf32>
    %26 = tpu.matmul %23, %25, %cst_25 {dimension_numbers = #tpu.dot_dimension_numbers<[1], [0], [0], [1], [0, 0, 1, 1], [], []>} : vector<256x32xbf16>, vector<32x128xbf16>, vector<256x128xf32> -> vector<256x128xf32>
    %27 = arith.addf %4, %26 : vector<256x128xf32>
    %c1 = arith.constant 1 : index
    %c0_26 = arith.constant 0 : index
    %c0_27 = arith.constant 0 : index
    %28 = vector.load %arg2[%c1, %c0_26, %c0_27] : memref<4x40x256xf32, #tpu.memory_space<vmem>>, vector<1x40x256xf32>
    %29 = vector.shape_cast %28 : vector<1x40x256xf32> to vector<40x256xf32>
    %cst_28 = arith.constant dense<0.000000e+00> : vector<40x16xf32>
    %30 = tpu.matmul %29, %1, %cst_28 {dimension_numbers = #tpu.dot_dimension_numbers<[1], [0], [0], [1], [0, 0, 1, 1], [], []>} : vector<40x256xf32>, vector<256x16xf32>, vector<40x16xf32> -> vector<40x16xf32>
    %31 = arith.truncf %30 : vector<40x16xf32> to vector<40x16xbf16>
    %c1_29 = arith.constant 1 : index
    %c0_30 = arith.constant 0 : index
    %c0_31 = arith.constant 0 : index
    %32 = vector.load %arg3[%c1_29, %c0_30, %c0_31] : memref<4x16x32xbf16, #tpu.memory_space<vmem>>, vector<1x16x32xbf16>
    %33 = vector.shape_cast %32 : vector<1x16x32xbf16> to vector<16x32xbf16>
    %cst_32 = arith.constant dense<0.000000e+00> : vector<40x32xf32>
    %34 = tpu.matmul %31, %33, %cst_32 {dimension_numbers = #tpu.dot_dimension_numbers<[1], [0], [0], [1], [0, 0, 1, 1], [], []>} : vector<40x16xbf16>, vector<16x32xbf16>, vector<40x32xf32> -> vector<40x32xf32>
    %c1_33 = arith.constant 1 : index
    %c0_34 = arith.constant 0 : index
    %c0_35 = arith.constant 0 : index
    %35 = vector.load %arg4[%c1_33, %c0_34, %c0_35] : memref<4x1x32xf32, #tpu.memory_space<vmem>>, vector<1x1x32xf32>
    %36 = vector.shape_cast %35 : vector<1x1x32xf32> to vector<1x32xf32>
    %37 = vector.broadcast %36 : vector<1x32xf32> to vector<40x32xf32>
    %38 = arith.mulf %34, %37 : vector<40x32xf32>
    %c1_36 = arith.constant 1 : index
    %c0_37 = arith.constant 0 : index
    %c0_38 = arith.constant 0 : index
    %39 = vector.load %arg5[%c1_36, %c0_37, %c0_38] : memref<4x1x32xf32, #tpu.memory_space<vmem>>, vector<1x1x32xf32>
    %40 = vector.shape_cast %39 : vector<1x1x32xf32> to vector<1x32xf32>
    %41 = vector.broadcast %40 : vector<1x32xf32> to vector<40x32xf32>
    %42 = arith.addf %38, %41 : vector<40x32xf32>
    %c1_39 = arith.constant 1 : index
    %c0_40 = arith.constant 0 : index
    %c0_41 = arith.constant 0 : index
    %43 = vector.load %arg6[%c1_39, %c0_40, %c0_41] : memref<4x256x40xf32, #tpu.memory_space<vmem>>, vector<1x256x40xf32>
    %44 = vector.shape_cast %43 : vector<1x256x40xf32> to vector<256x40xf32>
    %cst_42 = arith.constant dense<0.000000e+00> : vector<256x32xf32>
    %45 = tpu.matmul %44, %42, %cst_42 {dimension_numbers = #tpu.dot_dimension_numbers<[1], [0], [0], [1], [0, 0, 1, 1], [], []>} : vector<256x40xf32>, vector<40x32xf32>, vector<256x32xf32> -> vector<256x32xf32>
    %46 = arith.truncf %45 : vector<256x32xf32> to vector<256x32xbf16>
    %c1_43 = arith.constant 1 : index
    %c0_44 = arith.constant 0 : index
    %c0_45 = arith.constant 0 : index
    %47 = vector.load %arg7[%c1_43, %c0_44, %c0_45] : memref<4x32x128xbf16, #tpu.memory_space<vmem>>, vector<1x32x128xbf16>
    %48 = vector.shape_cast %47 : vector<1x32x128xbf16> to vector<32x128xbf16>
    %cst_46 = arith.constant dense<0.000000e+00> : vector<256x128xf32>
    %49 = tpu.matmul %46, %48, %cst_46 {dimension_numbers = #tpu.dot_dimension_numbers<[1], [0], [0], [1], [0, 0, 1, 1], [], []>} : vector<256x32xbf16>, vector<32x128xbf16>, vector<256x128xf32> -> vector<256x128xf32>
    %50 = arith.addf %27, %49 : vector<256x128xf32>
    %c2 = arith.constant 2 : index
    %c0_47 = arith.constant 0 : index
    %c0_48 = arith.constant 0 : index
    %51 = vector.load %arg2[%c2, %c0_47, %c0_48] : memref<4x40x256xf32, #tpu.memory_space<vmem>>, vector<1x40x256xf32>
    %52 = vector.shape_cast %51 : vector<1x40x256xf32> to vector<40x256xf32>
    %cst_49 = arith.constant dense<0.000000e+00> : vector<40x16xf32>
    %53 = tpu.matmul %52, %1, %cst_49 {dimension_numbers = #tpu.dot_dimension_numbers<[1], [0], [0], [1], [0, 0, 1, 1], [], []>} : vector<40x256xf32>, vector<256x16xf32>, vector<40x16xf32> -> vector<40x16xf32>
    %54 = arith.truncf %53 : vector<40x16xf32> to vector<40x16xbf16>
    %c2_50 = arith.constant 2 : index
    %c0_51 = arith.constant 0 : index
    %c0_52 = arith.constant 0 : index
    %55 = vector.load %arg3[%c2_50, %c0_51, %c0_52] : memref<4x16x32xbf16, #tpu.memory_space<vmem>>, vector<1x16x32xbf16>
    %56 = vector.shape_cast %55 : vector<1x16x32xbf16> to vector<16x32xbf16>
    %cst_53 = arith.constant dense<0.000000e+00> : vector<40x32xf32>
    %57 = tpu.matmul %54, %56, %cst_53 {dimension_numbers = #tpu.dot_dimension_numbers<[1], [0], [0], [1], [0, 0, 1, 1], [], []>} : vector<40x16xbf16>, vector<16x32xbf16>, vector<40x32xf32> -> vector<40x32xf32>
    %c2_54 = arith.constant 2 : index
    %c0_55 = arith.constant 0 : index
    %c0_56 = arith.constant 0 : index
    %58 = vector.load %arg4[%c2_54, %c0_55, %c0_56] : memref<4x1x32xf32, #tpu.memory_space<vmem>>, vector<1x1x32xf32>
    %59 = vector.shape_cast %58 : vector<1x1x32xf32> to vector<1x32xf32>
    %60 = vector.broadcast %59 : vector<1x32xf32> to vector<40x32xf32>
    %61 = arith.mulf %57, %60 : vector<40x32xf32>
    %c2_57 = arith.constant 2 : index
    %c0_58 = arith.constant 0 : index
    %c0_59 = arith.constant 0 : index
    %62 = vector.load %arg5[%c2_57, %c0_58, %c0_59] : memref<4x1x32xf32, #tpu.memory_space<vmem>>, vector<1x1x32xf32>
    %63 = vector.shape_cast %62 : vector<1x1x32xf32> to vector<1x32xf32>
    %64 = vector.broadcast %63 : vector<1x32xf32> to vector<40x32xf32>
    %65 = arith.addf %61, %64 : vector<40x32xf32>
    %c2_60 = arith.constant 2 : index
    %c0_61 = arith.constant 0 : index
    %c0_62 = arith.constant 0 : index
    %66 = vector.load %arg6[%c2_60, %c0_61, %c0_62] : memref<4x256x40xf32, #tpu.memory_space<vmem>>, vector<1x256x40xf32>
    %67 = vector.shape_cast %66 : vector<1x256x40xf32> to vector<256x40xf32>
    %cst_63 = arith.constant dense<0.000000e+00> : vector<256x32xf32>
    %68 = tpu.matmul %67, %65, %cst_63 {dimension_numbers = #tpu.dot_dimension_numbers<[1], [0], [0], [1], [0, 0, 1, 1], [], []>} : vector<256x40xf32>, vector<40x32xf32>, vector<256x32xf32> -> vector<256x32xf32>
    %69 = arith.truncf %68 : vector<256x32xf32> to vector<256x32xbf16>
    %c2_64 = arith.constant 2 : index
    %c0_65 = arith.constant 0 : index
    %c0_66 = arith.constant 0 : index
    %70 = vector.load %arg7[%c2_64, %c0_65, %c0_66] : memref<4x32x128xbf16, #tpu.memory_space<vmem>>, vector<1x32x128xbf16>
    %71 = vector.shape_cast %70 : vector<1x32x128xbf16> to vector<32x128xbf16>
    %cst_67 = arith.constant dense<0.000000e+00> : vector<256x128xf32>
    %72 = tpu.matmul %69, %71, %cst_67 {dimension_numbers = #tpu.dot_dimension_numbers<[1], [0], [0], [1], [0, 0, 1, 1], [], []>} : vector<256x32xbf16>, vector<32x128xbf16>, vector<256x128xf32> -> vector<256x128xf32>
    %73 = arith.addf %50, %72 : vector<256x128xf32>
    %c3 = arith.constant 3 : index
    %c0_68 = arith.constant 0 : index
    %c0_69 = arith.constant 0 : index
    %74 = vector.load %arg2[%c3, %c0_68, %c0_69] : memref<4x40x256xf32, #tpu.memory_space<vmem>>, vector<1x40x256xf32>
    %75 = vector.shape_cast %74 : vector<1x40x256xf32> to vector<40x256xf32>
    %cst_70 = arith.constant dense<0.000000e+00> : vector<40x16xf32>
    %76 = tpu.matmul %75, %1, %cst_70 {dimension_numbers = #tpu.dot_dimension_numbers<[1], [0], [0], [1], [0, 0, 1, 1], [], []>} : vector<40x256xf32>, vector<256x16xf32>, vector<40x16xf32> -> vector<40x16xf32>
    %77 = arith.truncf %76 : vector<40x16xf32> to vector<40x16xbf16>
    %c3_71 = arith.constant 3 : index
    %c0_72 = arith.constant 0 : index
    %c0_73 = arith.constant 0 : index
    %78 = vector.load %arg3[%c3_71, %c0_72, %c0_73] : memref<4x16x32xbf16, #tpu.memory_space<vmem>>, vector<1x16x32xbf16>
    %79 = vector.shape_cast %78 : vector<1x16x32xbf16> to vector<16x32xbf16>
    %cst_74 = arith.constant dense<0.000000e+00> : vector<40x32xf32>
    %80 = tpu.matmul %77, %79, %cst_74 {dimension_numbers = #tpu.dot_dimension_numbers<[1], [0], [0], [1], [0, 0, 1, 1], [], []>} : vector<40x16xbf16>, vector<16x32xbf16>, vector<40x32xf32> -> vector<40x32xf32>
    %c3_75 = arith.constant 3 : index
    %c0_76 = arith.constant 0 : index
    %c0_77 = arith.constant 0 : index
    %81 = vector.load %arg4[%c3_75, %c0_76, %c0_77] : memref<4x1x32xf32, #tpu.memory_space<vmem>>, vector<1x1x32xf32>
    %82 = vector.shape_cast %81 : vector<1x1x32xf32> to vector<1x32xf32>
    %83 = vector.broadcast %82 : vector<1x32xf32> to vector<40x32xf32>
    %84 = arith.mulf %80, %83 : vector<40x32xf32>
    %c3_78 = arith.constant 3 : index
    %c0_79 = arith.constant 0 : index
    %c0_80 = arith.constant 0 : index
    %85 = vector.load %arg5[%c3_78, %c0_79, %c0_80] : memref<4x1x32xf32, #tpu.memory_space<vmem>>, vector<1x1x32xf32>
    %86 = vector.shape_cast %85 : vector<1x1x32xf32> to vector<1x32xf32>
    %87 = vector.broadcast %86 : vector<1x32xf32> to vector<40x32xf32>
    %88 = arith.addf %84, %87 : vector<40x32xf32>
    %c3_81 = arith.constant 3 : index
    %c0_82 = arith.constant 0 : index
    %c0_83 = arith.constant 0 : index
    %89 = vector.load %arg6[%c3_81, %c0_82, %c0_83] : memref<4x256x40xf32, #tpu.memory_space<vmem>>, vector<1x256x40xf32>
    %90 = vector.shape_cast %89 : vector<1x256x40xf32> to vector<256x40xf32>
    %cst_84 = arith.constant dense<0.000000e+00> : vector<256x32xf32>
    %91 = tpu.matmul %90, %88, %cst_84 {dimension_numbers = #tpu.dot_dimension_numbers<[1], [0], [0], [1], [0, 0, 1, 1], [], []>} : vector<256x40xf32>, vector<40x32xf32>, vector<256x32xf32> -> vector<256x32xf32>
    %92 = arith.truncf %91 : vector<256x32xf32> to vector<256x32xbf16>
    %c3_85 = arith.constant 3 : index
    %c0_86 = arith.constant 0 : index
    %c0_87 = arith.constant 0 : index
    %93 = vector.load %arg7[%c3_85, %c0_86, %c0_87] : memref<4x32x128xbf16, #tpu.memory_space<vmem>>, vector<1x32x128xbf16>
    %94 = vector.shape_cast %93 : vector<1x32x128xbf16> to vector<32x128xbf16>
    %cst_88 = arith.constant dense<0.000000e+00> : vector<256x128xf32>
    %95 = tpu.matmul %92, %94, %cst_88 {dimension_numbers = #tpu.dot_dimension_numbers<[1], [0], [0], [1], [0, 0, 1, 1], [], []>} : vector<256x32xbf16>, vector<32x128xbf16>, vector<256x128xf32> -> vector<256x128xf32>
    %96 = arith.addf %73, %95 : vector<256x128xf32>
    %c0_89 = arith.constant 0 : index
    %c0_90 = arith.constant 0 : index
    %97 = vector.load %arg9[%c0_89, %c0_90] : memref<1x128xf32, #tpu.memory_space<vmem>>, vector<1x128xf32>
    %98 = vector.broadcast %97 : vector<1x128xf32> to vector<256x128xf32>
    %99 = arith.mulf %96, %98 : vector<256x128xf32>
    %c0_91 = arith.constant 0 : index
    %c0_92 = arith.constant 0 : index
    %100 = vector.load %arg10[%c0_91, %c0_92] : memref<1x128xf32, #tpu.memory_space<vmem>>, vector<1x128xf32>
    %101 = vector.broadcast %100 : vector<1x128xf32> to vector<256x128xf32>
    %102 = arith.addf %99, %101 : vector<256x128xf32>
    %cst_93 = arith.constant 0.000000e+00 : f32
    %103 = vector.broadcast %cst_93 : f32 to vector<256x128xf32>
    %104 = arith.maximumf %102, %103 : vector<256x128xf32>
    %c0_94 = arith.constant 0 : index
    %c0_95 = arith.constant 0 : index
    %c0_96 = arith.constant 0 : index
    %105 = vector.load %arg11[%c0_94, %c0_95, %c0_96] : memref<1x256x128xf32, #tpu.memory_space<vmem>>, vector<1x256x128xf32>
    %106 = vector.shape_cast %105 : vector<1x256x128xf32> to vector<256x128xf32>
    %107 = vector.shape_cast %104 : vector<256x128xf32> to vector<1x256x128xf32>
    tpu.vector_store %arg11[%c0_94, %c0_95, %c0_96], %107 {strides = array<i32>} : memref<1x256x128xf32, #tpu.memory_space<vmem>>, vector<1x256x128xf32>,
    return
  }
  func.func @transform_0(%arg0: i32) -> (i32, i32, i32) {
    %c0_i32 = arith.constant 0 : i32
    %c0_i32_0 = arith.constant 0 : i32
    %c0_i32_1 = arith.constant 0 : i32
    return %arg0, %c0_i32, %c0_i32_0 : i32, i32, i32
  }
  func.func @transform_1(%arg0: i32) -> (i32, i32, i32) {
    %c0_i32 = arith.constant 0 : i32
    %c0_i32_0 = arith.constant 0 : i32
    %c0_i32_1 = arith.constant 0 : i32
    %c0_i32_2 = arith.constant 0 : i32
    return %c0_i32, %c0_i32_0, %c0_i32_1 : i32, i32, i32
  }
  func.func @transform_2(%arg0: i32) -> (i32, i32, i32) {
    %c0_i32 = arith.constant 0 : i32
    %c0_i32_0 = arith.constant 0 : i32
    %c0_i32_1 = arith.constant 0 : i32
    %c0_i32_2 = arith.constant 0 : i32
    return %c0_i32, %c0_i32_0, %c0_i32_1 : i32, i32, i32
  }
  func.func @transform_3(%arg0: i32) -> (i32, i32, i32) {
    %c0_i32 = arith.constant 0 : i32
    %c0_i32_0 = arith.constant 0 : i32
    %c0_i32_1 = arith.constant 0 : i32
    %c0_i32_2 = arith.constant 0 : i32
    return %c0_i32, %c0_i32_0, %c0_i32_1 : i32, i32, i32
  }
  func.func @transform_4(%arg0: i32) -> (i32, i32, i32) {
    %c0_i32 = arith.constant 0 : i32
    %c0_i32_0 = arith.constant 0 : i32
    %c0_i32_1 = arith.constant 0 : i32
    %c0_i32_2 = arith.constant 0 : i32
    return %c0_i32, %c0_i32_0, %c0_i32_1 : i32, i32, i32
  }
  func.func @transform_5(%arg0: i32) -> (i32, i32, i32) {
    %c0_i32 = arith.constant 0 : i32
    %c0_i32_0 = arith.constant 0 : i32
    %c0_i32_1 = arith.constant 0 : i32
    %c0_i32_2 = arith.constant 0 : i32
    return %c0_i32, %c0_i32_0, %c0_i32_1 : i32, i32, i32
  }
  func.func @transform_6(%arg0: i32) -> (i32, i32, i32) {
    %c0_i32 = arith.constant 0 : i32
    %c0_i32_0 = arith.constant 0 : i32
    %c0_i32_1 = arith.constant 0 : i32
    %c0_i32_2 = arith.constant 0 : i32
    return %c0_i32, %c0_i32_0, %c0_i32_1 : i32, i32, i32
  }
  func.func @transform_7(%arg0: i32) -> (i32, i32) {
    %c0_i32 = arith.constant 0 : i32
    %c0_i32_0 = arith.constant 0 : i32
    %c0_i32_1 = arith.constant 0 : i32
    return %c0_i32, %c0_i32_0 : i32, i32
  }
  func.func @transform_8(%arg0: i32) -> (i32, i32) {
    %c0_i32 = arith.constant 0 : i32
    %c0_i32_0 = arith.constant 0 : i32
    %c0_i32_1 = arith.constant 0 : i32
    return %c0_i32, %c0_i32_0 : i32, i32
  }
  func.func @transform_9(%arg0: i32) -> (i32, i32) {
    %c0_i32 = arith.constant 0 : i32
    %c0_i32_0 = arith.constant 0 : i32
    %c0_i32_1 = arith.constant 0 : i32
    return %c0_i32, %c0_i32_0 : i32, i32
  }
  func.func @transform_10(%arg0: i32) -> (i32, i32, i32) {
    %c0_i32 = arith.constant 0 : i32
    %c0_i32_0 = arith.constant 0 : i32
    %c0_i32_1 = arith.constant 0 : i32
    return %arg0, %c0_i32, %c0_i32_0 : i32, i32, i32
  }
}

</mosaic_0001>

<bundles_post_ra>
// kernel: tpu_custom_call.1
= control target key start
LH: loop header
LB: loop body
LE: loop exit
PB: predicated region body
PF: predicated region fallthrough
CT: control target
= control target key end

     0   :  { %15 = vsyncpa [#allocation3], 0  ;;  %s5227_s0 = inlined_call_operand.vmem [shape: f32[2,256,16], index: 0, kind: input, shape index: {}]   ;;  %s5228_s1 = inlined_call_operand.vmem [shape: f32[4,40,256], index: 1, kind: input, shape index: {}]   ;;  %s5229_s2 = inlined_call_operand.vmem [shape: bf16[4,16,32], index: 2, kind: input, shape index: {}]   ;;  %s5230_s3 = inlined_call_operand.vmem [shape: f32[4,1,32], index: 3, kind: input, shape index: {}]   ;;  %s5231_s4 = inlined_call_operand.vmem [shape: f32[4,1,32], index: 4, kind: input, shape index: {}]   ;;  %s5232_s5 = inlined_call_operand.vmem [shape: f32[4,256,40], index: 5, kind: input, shape index: {}]   ;;  %s5233_s6 = inlined_call_operand.vmem [shape: bf16[4,32,128], index: 6, kind: input, shape index: {}]   ;;  %s5234_s7 = inlined_call_operand.vmem [shape: bf16[16,128], index: 7, kind: input, shape index: {}]   ;;  %s5235_s8 = inlined_call_operand.vmem [shape: f32[1,128], index: 8, kind: input, shape index: {}]   ;;  %s5236_s9 = inlined_call_operand.vmem [shape: f32[1,128], index: 9, kind: input, shape index: {}]   ;;  %s5237_s10 = inlined_call_operand.hbm [shape: f32[2,256,128], index: 10, kind: output, shape index: {}]  }
   0x1   :  { %17 = vsyncpa [#allocation3 + $0x1], 0  ;;  %s3702_s13 = smov 0   ;;  %s3704_s14 = smov 0  }
   0x2   :  { %s3706_s15 = smov 0   ;;  %s3708_s16 = smov 0  }
   0x3 LB: > { %s3723_s17 = sadd.s32 4294967295, %s3643_s16   ;;  %s3063_s18 = sadd.s32 4294967294, %s3643_s16   ;;  %s3643_s16 = sphi %s3708_s16, %s5315_s16   ;;  %s3639_s15 = sphi %s3706_s15, %s5314_s15   ;;  %s3635_s14 = sphi %s3704_s14, %s5313_s14   ;;  %s3631_s13 = sphi %s3702_s13, %s5312_s13  }
   0x4   : > { %s3727_s19 = sadd.s32 1, %s3643_s16   ;;  %s245_s20 = sadd.s32 1, %s3639_s15 }
   0x5   : > { %s242_s21 = ssub.s32 %s3643_s16, %s3727_s19  ;;  %p255_p0 = scmp.ne.s32.totalorder %s3639_s15, %s3635_s14 }
   0x6   : > { %p243_p1 = scmp.eq.s32.totalorder %s242_s21, 0  ;;  %p256_p2 = scmp.eq.s32.totalorder %s3723_s17, 1 }
   0x7   : > { %p261_p3 = scmp.ne.s32.totalorder %s3635_s14, %s3631_s13  ;;  %p262_p4 = scmp.eq.s32.totalorder %s3063_s18, 1 }
   0x8   : > { %s3738_s22 = scalar_select %p243_p1, %s3639_s15, %s245_s20  }
   0x9   : > { %p3740_p5 = por %p256_p2, %p255_p0  ;;  %p3744_p6 = por %p262_p4, %p261_p3 }
   0xa   : > { %p3066_p7 = scmp.ge.s32.totalorder %s3643_s16, 1  ;;  %p315_p8 = scmp.lt.s32.totalorder %s3643_s16, 3 }
   0xc   : > { %p316_p9 = pnand %p3066_p7, %p315_p8 }
   0xe   : > { %319 = sbr.rel (%p316_p9) target bundleno = 1680 (0x690), region = 60 }
  0x13   : > { %p353_p10 = scmp.lt.s32.totalorder %s3723_s17, 1  ;;  %v409_v32 = vld [vmem:[%s5228_s1] sm:$0xff]  ;;  %v410_v33 = vld [vmem:[%s5228_s1 + $0x8] sm:$0xff]  ;;  %v411_v34 = vld [vmem:[%s5228_s1 + $0x10] sm:$0xff]  ;;  %vm494_vm0 = vcmask 130048   ;;  %vm577_vm1 = vcmask 326656  }
  0x14   : > { %v412_v35 = vld [vmem:[%s5228_s1 + $0x18] sm:$0xff]  ;;  %v413_v36 = vld [vmem:[%s5228_s1 + $0x20] sm:$0xff]  ;;  %v414_v37 = vld [vmem:[%s5228_s1 + $0x28] sm:$0xff]  ;;  %vm819_vm2 = vcmask 261120   ;;  %s350_s11 = sand.u32 1, %s3635_s14  }
  0x15   : > { %s354_s25 = scalar_select %p353_p10, %s3723_s17, 1  ;;  %v415_v38 = vld [vmem:[%s5228_s1 + $0x30] sm:$0xff]  ;;  %v416_v39 = vld [vmem:[%s5228_s1 + $0x38] sm:$0xff]  ;;  %v418_v40 = vld [vmem:[%s5228_s1 + $0x48] sm:$0xff] }
  0x16   : > { %v417_v41 = vld [vmem:[%s5228_s1 + $0x40] sm:$0xff]  ;;  %v3153_v42 = vld [vmem:[%s5228_s1 + $0x50] sm:$0xff]  ;;  %v3154_v47 = vld [vmem:[%s5228_s1 + $0x58] sm:$0xff]  ;;  %s3067_s20 = sshll.u32 %s350_s11, 8 }
  0x17   : > { %s3497_s26 = sshll.u32 %s354_s25, 8  ;;  %v3155_v43 = vld [vmem:[%s5228_s1 + $0x60] sm:$0xff]  ;;  %v3157_v44 = vld [vmem:[%s5228_s1 + $0x70] sm:$0xff]  ;;  %v3156_v48 = vld [vmem:[%s5228_s1 + $0x68] sm:$0xff]  ;;  %s5016_s21 = scalar_lea.vmem [#allocation2], %s3067_s20 }
  0x18   : > { %s3755_s29 = scalar_lea.vmem %s5227_s0, %s3497_s26  ;;  %v3159_v45 = vld [vmem:[%s5228_s1 + $0x80] sm:$0xff]  ;;  %v3161_v46 = vld [vmem:[%s5228_s1 + $0x90] sm:$0xff]  ;;  %v3158_v49 = vld [vmem:[%s5228_s1 + $0x78] sm:$0xff]  ;;  %s3511_s25 = sshll.u32 %s3723_s17, 8 }
  0x19   : > { %v3758_v0 = vld [vmem:[%s3755_s29 + $0x78] sm:$0xff]  ;;  %v3764_v2 = vld [vmem:[%s3755_s29 + $0x70] sm:$0xff]  ;;  %v3772_v4 = vld [vmem:[%s3755_s29 + $0x68] sm:$0xff]  ;;  %s2997_s28 = scalar_lea.hbm %s5237_s10, %s3511_s25  ;;  %s2986_s17 = scalar_lea.sflag [#allocation3], %s350_s11 }
  0x1a   : > { %v3761_v1 = vld [vmem:[%s3755_s29 + $0xf8] sm:$0xff]  ;;  %419 = vmatpush.msra.mxu0 %v3758_v0  ;;  %v3769_v3 = vld [vmem:[%s3755_s29 + $0xf0] sm:$0xff]  ;;  %v3775_v5 = vld [vmem:[%s3755_s29 + $0xe8] sm:$0xff]  ;;  %s3000_s30 = sshll.u32 %s2997_s28, 4  ;;  %s3601_s26 = scalar_lea.hbm %s5237_s10, 512  ;;  %s3001_s30 = int_to_ptr.hbm [resolvable:$true] %s3000_s30 }
  0x1b   : > { %451 = vmatpush.msra.mxu1 %v3761_v1  ;;  %v3780_v6 = vld [vmem:[%s3755_s29 + $0x60] sm:$0xff]  ;;  %v3788_v8 = vld [vmem:[%s3755_s29 + $0x58] sm:$0xff]  ;;  %v3796_v10 = vld [vmem:[%s3755_s29 + $0x50] sm:$0xff]  ;;  %s3595_s12 = sshra.s32 %s3001_s30, 4  ;;  %s3596_s12 = int_to_ptr.hbm [resolvable:$true] %s3595_s12 }
  0x1c   : > { %420 = vmatpush.msra.mxu0 %v3764_v2  ;;  %v3783_v7 = vld [vmem:[%s3755_s29 + $0xe0] sm:$0xff]  ;;  %v3791_v9 = vld [vmem:[%s3755_s29 + $0xd8] sm:$0xff]  ;;  %v3799_v11 = vld [vmem:[%s3755_s29 + $0xd0] sm:$0xff]  ;;  %s3597_s18 = scalar_lea.hbm %s3596_s12, 256  ;;  %p3602_p0 = scmp.lt.s32.totalorder %s3596_s12, %s5237_s10 }
  0x1d   : > { %452 = vmatpush.msra.mxu1 %v3769_v3  ;;  %v3804_v12 = vld [vmem:[%s3755_s29 + $0x48] sm:$0xff]  ;;  %v3812_v14 = vld [vmem:[%s3755_s29 + $0x40] sm:$0xff]  ;;  %v3820_v16 = vld [vmem:[%s3755_s29 + $0x38] sm:$0xff]  ;;  %p3598_p11 = scmp.ne.s32.totalorder %s3596_s12, %s3597_s18  ;;  %p3603_p1 = scmp.lt.s32.totalorder %s3601_s26, %s3597_s18 }
  0x1e   : > { %421 = vmatpush.msra.mxu0 %v3772_v4  ;;  %v3807_v13 = vld [vmem:[%s3755_s29 + $0xc8] sm:$0xff]  ;;  %v3815_v15 = vld [vmem:[%s3755_s29 + $0xc0] sm:$0xff]  ;;  %v3823_v17 = vld [vmem:[%s3755_s29 + $0xb8] sm:$0xff] }
  0x1f   : > { %453 = vmatpush.msra.mxu1 %v3775_v5  ;;  %v3828_v18 = vld [vmem:[%s3755_s29 + $0x30] sm:$0xff]  ;;  %v3836_v20 = vld [vmem:[%s3755_s29 + $0x28] sm:$0xff]  ;;  %v3844_v22 = vld [vmem:[%s3755_s29 + $0x20] sm:$0xff]  ;;  %p3599_p12 = pnand %p3598_p11, %p3740_p5  ;;  %p3604_p2 = por %p3603_p1, %p3602_p0 }
  0x20   : > { %422 = vmatpush.msra.mxu0 %v3780_v6  ;;  %v3831_v19 = vld [vmem:[%s3755_s29 + $0xb0] sm:$0xff]  ;;  %v3839_v21 = vld [vmem:[%s3755_s29 + $0xa8] sm:$0xff]  ;;  %v3847_v23 = vld [vmem:[%s3755_s29 + $0xa0] sm:$0xff] }
  0x21   : > { %454 = vmatpush.msra.mxu1 %v3783_v7  ;;  %v3852_v24 = vld [vmem:[%s3755_s29 + $0x18] sm:$0xff]  ;;  %v3860_v26 = vld [vmem:[%s3755_s29 + $0x10] sm:$0xff]  ;;  %v3868_v28 = vld [vmem:[%s3755_s29 + $0x8] sm:$0xff]  ;;  %p3600_p13 = pneg %p3599_p12 }
  0x22   : > { %423 = vmatpush.msra.mxu0 %v3788_v8  ;;  %v3855_v25 = vld [vmem:[%s3755_s29 + $0x98] sm:$0xff]  ;;  %v3863_v27 = vld [vmem:[%s3755_s29 + $0x90] sm:$0xff]  ;;  %v3871_v29 = vld [vmem:[%s3755_s29 + $0x88] sm:$0xff] }
  0x23   : > { %455 = vmatpush.msra.mxu1 %v3791_v9  ;;  %v3876_v30 = vld [vmem:[%s3755_s29] sm:$0xff]  ;;  %v3160_v50 = vld [vmem:[%s5228_s1 + $0x88] sm:$0xff]  ;;  %v3162_v52 = vld [vmem:[%s5228_s1 + $0x98] sm:$0xff]  ;;  %p3605_p3 = pnand %p3604_p2, %p3600_p13 }
  0x24   : > { %424 = vmatpush.msra.mxu0 %v3796_v10  ;;  %v3879_v31 = vld [vmem:[%s3755_s29 + $0x80] sm:$0xff] }
  0x25   : > { %456 = vmatpush.msra.mxu1 %v3799_v11  ;;  %v3499_v51 = vld [vmem:[%s5229_s2] sm:$0xff] }
  0x26   : > { %425 = vmatpush.msra.mxu0 %v3804_v12  ;;  %511 = vmatpush.bf16.msra.mxu2 %v3499_v51 }
  0x27   : > { %457 = vmatpush.msra.mxu1 %v3807_v13 }
  0x28   : > { %426 = vmatpush.msra.mxu0 %v3812_v14 }
  0x29   : > { %458 = vmatpush.msra.mxu1 %v3815_v15 }
  0x2a   : > { %427 = vmatpush.msra.mxu0 %v3820_v16 }
  0x2b   : > { %459 = vmatpush.msra.mxu1 %v3823_v17 }
  0x2c   : > { %428 = vmatpush.msra.mxu0 %v3828_v18 }
  0x2d   : > { %460 = vmatpush.msra.mxu1 %v3831_v19 }
  0x2e   : > { %429 = vmatpush.msra.mxu0 %v3836_v20 }
  0x2f   : > { %461 = vmatpush.msra.mxu1 %v3839_v21 }
  0x30   : > { %430 = vmatpush.msra.mxu0 %v3844_v22 }
  0x31   : > { %462 = vmatpush.msra.mxu1 %v3847_v23 }
  0x32   : > { %431 = vmatpush.msra.mxu0 %v3852_v24 }
  0x33   : > { %463 = vmatpush.msra.mxu1 %v3855_v25 }
  0x34   : > { %432 = vmatpush.msra.mxu0 %v3860_v26 }
  0x35   : > { %464 = vmatpush.msra.mxu1 %v3863_v27 }
  0x36   : > { %433 = vmatpush.msra.mxu0 %v3868_v28 }
  0x37   : > { %465 = vmatpush.msra.mxu1 %v3871_v29 }
  0x38   : > { %434 = vmatpush.msra.mxu0 %v3876_v30 }
  0x39   : > { %466 = vmatpush.msra.mxu1 %v3879_v31  ;;  %435 = vmatmul.f32.vlgmr.msra.gmra.mxu0 %v409_v32 }
  0x3a   : > { %467 = vmatmul.f32.vlgmr.msra.gmra.mxu1 %v410_v33 }
  0x3b   : > { %1111 = vmatpush.msrb.mxu1 %v3758_v0 }
  0x3d   : > { %1112 = vmatpush.msrb.mxu1 %v3764_v2 }
  0x3f   : > { %1113 = vmatpush.msrb.mxu1 %v3772_v4 }
  0x41   : > { %1114 = vmatpush.msrb.mxu1 %v3780_v6  ;;  %438 = vmatmul.f32.gmra.mxu0 %v411_v34 }
  0x42   : > { %470 = vmatmul.f32.gmra.mxu1 %v412_v35 }
  0x43   : > { %1115 = vmatpush.msrb.mxu1 %v3788_v8 }
  0x45   : > { %1116 = vmatpush.msrb.mxu1 %v3796_v10 }
  0x47   : > { %1117 = vmatpush.msrb.mxu1 %v3804_v12 }
  0x49   : > { %1118 = vmatpush.msrb.mxu1 %v3812_v14  ;;  %441 = vmatmul.f32.gmra.mxu0 %v413_v36 }
  0x4a   : > { %473 = vmatmul.f32.gmra.mxu1 %v414_v37 }
  0x4b   : > { %1119 = vmatpush.msrb.mxu1 %v3820_v16 }
  0x4d   : > { %1120 = vmatpush.msrb.mxu1 %v3828_v18 }
  0x4f   : > { %1121 = vmatpush.msrb.mxu1 %v3836_v20 }
  0x51   : > { %1122 = vmatpush.msrb.mxu1 %v3844_v22  ;;  %444 = vmatmul.f32.gmra.mxu0 %v415_v38 }
  0x52   : > { %476 = vmatmul.f32.gmra.mxu1 %v416_v39 }
  0x53   : > { %1123 = vmatpush.msrb.mxu1 %v3852_v24 }
  0x55   : > { %1124 = vmatpush.msrb.mxu1 %v3860_v26 }
  0x57   : > { %1125 = vmatpush.msrb.mxu1 %v3868_v28 }
  0x59   : > { %1126 = vmatpush.msrb.mxu1 %v3876_v30  ;;  %447 = vmatmul.f32.gmra.mxu0 %v417_v41 }
  0x5a   : > { %479 = vmatmul.f32.gmra.mxu1 %v418_v40 }
  0x5b   : > { %1143 = vmatpush.msra.mxu1 %v3761_v1 }
  0x5d   : > { %1144 = vmatpush.msra.mxu1 %v3769_v3 }
  0x5f   : > { %1145 = vmatpush.msra.mxu1 %v3775_v5 }
  0x61   : > { %1146 = vmatpush.msra.mxu1 %v3783_v7 }
  0x62   : > { %1127 = vmatmul.f32.vlgmr.msrb.gmra.mxu1 %v3153_v42  ;;  %v3502_v42 = vld [vmem:[%s5229_s2 + $0x8] sm:$0xff] }
  0x63   : > { %1147 = vmatpush.msra.mxu1 %v3791_v9 }
  0x65   : > { %1148 = vmatpush.msra.mxu1 %v3799_v11 }
  0x67   : > { %1149 = vmatpush.msra.mxu1 %v3807_v13 }
  0x69   : > { %1150 = vmatpush.msra.mxu1 %v3815_v15 }
  0x6a   : > { %1130 = vmatmul.f32.gmra.mxu1 %v3155_v43 }
  0x6b   : > { %1151 = vmatpush.msra.mxu1 %v3823_v17 }
  0x6d   : > { %1152 = vmatpush.msra.mxu1 %v3831_v19 }
  0x6f   : > { %1153 = vmatpush.msra.mxu1 %v3839_v21 }
  0x71   : > { %1154 = vmatpush.msra.mxu1 %v3847_v23 }
  0x72   : > { %1133 = vmatmul.f32.gmra.mxu1 %v3157_v44 }
  0x73   : > { %1155 = vmatpush.msra.mxu1 %v3855_v25 }
  0x75   : > { %1156 = vmatpush.msra.mxu1 %v3863_v27 }
  0x77   : > { %1157 = vmatpush.msra.mxu1 %v3871_v29 }
  0x79   : > { %1158 = vmatpush.msra.mxu1 %v3879_v31 }
  0x7a   : > { %1136 = vmatmul.f32.gmra.mxu1 %v3159_v45 }
  0x7b   : > { %1203 = vmatpush.bf16.msrb.mxu1 %v3502_v42 }
  0x82   : > { %1139 = vmatmul.f32.gmra.mxu1 %v3161_v46 }
  0x8a   : > { %1159 = vmatmul.f32.vlgmr.msra.gmra.mxu1 %v3154_v47 }
  0x92   : > { %1162 = vmatmul.f32.gmra.mxu1 %v3156_v48 }
  0x9a   : > { %1165 = vmatmul.f32.gmra.mxu1 %v3158_v49 }
  0xa2   : > { %1168 = vmatmul.f32.gmra.mxu1 %v3160_v50 }
  0xaa   : > { %1171 = vmatmul.f32.gmra.mxu1 %v3162_v52 }
  0xb6   : > { %v436_v53 = vpop.f32.mrf.mxu0 }
  0xb7   : > { %v468_v54 = vpop.f32.mrf.mxu1 }
  0xb8   : > { %v469_v57 = vadd.f32 %v468_v54, %v436_v53 }
  0xbe   : > { %v439_v55 = vpop.f32.mrf.mxu0 }
  0xbf   : > { %v471_v56 = vpop.f32.mrf.mxu1 }
  0xc0   : > { %v472_v58 = vadd.f32 %v471_v56, %v439_v55 }
  0xc2   : > { %v483_v59 = vpack.c.bf16 %v472_v58, %v469_v57 }
  0xc4   : > { %3074 = vmatmul.msk.bf16.vlgmr.msra.gmra.mxu2 %vm494_vm0, %v483_v59 }
  0xc6   : > { %v442_v60 = vpop.f32.mrf.mxu0 }
  0xc7   : > { %v474_v61 = vpop.f32.mrf.mxu1 }
  0xc8   : > { %v475_v32 = vadd.f32 %v474_v61, %v442_v60 }
  0xce   : > { %v445_v62 = vpop.f32.mrf.mxu0 }
  0xcf   : > { %v477_v63 = vpop.f32.mrf.mxu1 }
  0xd0   : > { %v478_v33 = vadd.f32 %v477_v63, %v445_v62  ;;  %v3563_v62 = vld [vmem:[%s5230_s3] ss:$0 sm:$0xff] }
  0xd2   : > { %v484_v34 = vpack.c.bf16 %v478_v33, %v475_v32 }
  0xd4   : > { %3075 = vmatmul.msk.bf16.gmra.mxu2 %vm494_vm0, %v484_v34  ;;  %v3564_v34 = vld [vmem:[%s5231_s4] ss:$0 sm:$0xff] }
  0xd6   : > { %v448_v36 = vpop.f32.mrf.mxu0 }
  0xd7   : > { %v480_v35 = vpop.f32.mrf.mxu1 }
  0xd8   : > { %v481_v37 = vadd.f32 %v480_v35, %v448_v36 }
  0xda   : > { %v485_v39 = vpack.c.bf16 %v481_v37, %v481_v37 }
  0xdf   : > { %v1128_v38 = vpop.f32.mrf.mxu1 }
  0xe4   : > { %3076 = vmatmul.msk.bf16.gmra.mxu2 %vm494_vm0, %v485_v39 }
  0xe7   : > { %v1131_v40 = vpop.f32.mrf.mxu1 }
  0xef   : > { %v1134_v41 = vpop.f32.mrf.mxu1 }
  0xf7   : > { %v1137_v43 = vpop.f32.mrf.mxu1 }
  0xff   : > { %v1140_v44 = vpop.f32.mrf.mxu1 }
 0x107   : > { %v1160_v45 = vpop.f32.mrf.mxu1 }
 0x108   : > { %v1161_v46 = vadd.f32 %v1160_v45, %v1128_v38  ;;  %v546_v45 = vld [vmem:[%s5232_s5 + $0x8] sm:$0xff] }
 0x10f   : > { %v1163_v47 = vpop.f32.mrf.mxu1 }
 0x110   : > { %v1164_v48 = vadd.f32 %v1163_v47, %v1131_v40  ;;  %v557_v47 = vld [vmem:[%s5232_s5 + $0x60] sm:$0xff] }
 0x112   : > { %v1175_v49 = vpack.c.bf16 %v1164_v48, %v1161_v46  ;;  %v547_v46 = vld [vmem:[%s5232_s5 + $0x10] sm:$0xff]  ;;  %v548_v48 = vld [vmem:[%s5232_s5 + $0x18] sm:$0xff] }
 0x114   : > { %3169 = vmatmul.msk.bf16.vlgmr.msrb.gmra.mxu1 %vm494_vm0, %v1175_v49  ;;  %v558_v49 = vld [vmem:[%s5232_s5 + $0x68] sm:$0xff] }
 0x117   : > { %v1166_v50 = vpop.f32.mrf.mxu1 }
 0x118   : > { %v1167_v51 = vadd.f32 %v1166_v50, %v1134_v41 }
 0x11f   : > { %v1169_v52 = vpop.f32.mrf.mxu1 }
 0x120   : > { %v1170_v53 = vadd.f32 %v1169_v52, %v1137_v43  ;;  %v559_v52 = vld [vmem:[%s5232_s5 + $0x70] sm:$0xff] }
 0x122   : > { %v1176_v54 = vpack.c.bf16 %v1170_v53, %v1167_v51  ;;  %v549_v51 = vld [vmem:[%s5232_s5 + $0x20] sm:$0xff] }
 0x124   : > { %3170 = vmatmul.msk.bf16.gmra.mxu1 %vm494_vm0, %v1176_v54  ;;  %v550_v54 = vld [vmem:[%s5232_s5 + $0x28] sm:$0xff] }
 0x127   : > { %v1172_v55 = vpop.f32.mrf.mxu1 }
 0x128   : > { %v1173_v56 = vadd.f32 %v1172_v55, %v1140_v44  ;;  %v545_v44 = vld [vmem:[%s5232_s5] sm:$0xff]  ;;  %v560_v55 = vld [vmem:[%s5232_s5 + $0x78] sm:$0xff] }
 0x12a   : > { %v1177_v57 = vpack.c.bf16 %v1173_v56, %v1173_v56  ;;  %v3501_v56 = vld [vmem:[%s5233_s6 + $0x8] sm:$0xff] }
 0x12b   : > { %874 = vmatpush.bf16.msrb.mxu2 %v3501_v56  ;;  %v566_v56 = vld [vmem:[%s5232_s5 + $0xa8] sm:$0xff] }
 0x134   : > { %3171 = vmatmul.msk.bf16.gmra.mxu1 %vm494_vm0, %v1177_v57  ;;  %v3500_v57 = vld [vmem:[%s5233_s6] sm:$0xff] }
 0x135   : > { %875 = vmatpush.bf16.msrb.mxu2 %v3500_v57  ;;  %v3177_v57 = vld [vmem:[%s5232_s5 + $0x118] sm:$0xff] }
 0x147   : > { %v513_v58 = vpop.f32.mrf.mxu2 }
 0x148   : > { %v531_v39 = vmul.f32 %v3563_v62, %v513_v58 }
 0x14a   : > { %v540_v43 = vadd.f32 %v3564_v34, %v531_v39 }
 0x14f   : > { %v515_v59 = vpop.f32.mrf.mxu2 }
 0x150   : > { %v532_v37 = vmul.f32 %v3563_v62, %v515_v59  ;;  %v551_v59 = vld [vmem:[%s5232_s5 + $0x30] sm:$0xff] }
 0x152   : > { %v541_v42 = vadd.f32 %v3564_v34, %v532_v37 }
 0x157   : > { %v518_v60 = vpop.f32.mrf.mxu2 }
 0x158   : > { %v533_v35 = vmul.f32 %v3563_v62, %v518_v60  ;;  %v561_v60 = vld [vmem:[%s5232_s5 + $0x80] sm:$0xff] }
 0x15a   : > { %v542_v40 = vadd.f32 %v3564_v34, %v533_v35 }
 0x15f   : > { %v520_v61 = vpop.f32.mrf.mxu2 }
 0x160   : > { %v534_v32 = vmul.f32 %v3563_v62, %v520_v61 }
 0x162   : > { %v543_v38 = vadd.f32 %v3564_v34, %v534_v32  ;;  %v3565_v32 = vld [vmem:[%s5230_s3 + $0x1] ss:$0 sm:$0xff] }
 0x167   : > { %v523_v63 = vpop.f32.mrf.mxu2 }
 0x168   : > { %v535_v33 = vmul.f32 %v3563_v62, %v523_v63  ;;  %v552_v62 = vld [vmem:[%s5232_s5 + $0x38] sm:$0xff]  ;;  %v562_v63 = vld [vmem:[%s5232_s5 + $0x88] sm:$0xff] }
 0x16a   : > { %v544_v36 = vadd.f32 %v3564_v34, %v535_v33  ;;  %v3566_v33 = vld [vmem:[%s5231_s4 + $0x1] ss:$0 sm:$0xff] }
 0x16c   : > { %685 = vmatpush.msrb.mxu0 %v544_v36  ;;  %3512 = vmatpush.msra.mxu3 %v544_v36 }
 0x16e   : > { %686 = vmatpush.msrb.mxu0 %v543_v38  ;;  %3513 = vmatpush.msra.mxu3 %v543_v38  ;;  %v553_v38 = vld [vmem:[%s5232_s5 + $0x40] sm:$0xff] }
 0x16f   : > { %v525_v41 = vpop.f32.mrf.mxu2 }
 0x170   : > { %687 = vmatpush.msrb.mxu0 %v542_v40  ;;  %3514 = vmatpush.msra.mxu3 %v542_v40 }
 0x172   : > { %688 = vmatpush.msrb.mxu0 %v541_v42  ;;  %3515 = vmatpush.msra.mxu3 %v541_v42  ;;  %v563_v42 = vld [vmem:[%s5232_s5 + $0x90] sm:$0xff] }
 0x174   : > { %689 = vmatpush.msrb.mxu0 %v540_v43  ;;  %3516 = vmatpush.msra.mxu3 %v540_v43 }
 0x175   : > { %3077 = vmatmul.msk.f32.vlgmr.msrb.gmra.mxu0 %vm577_vm1, %v545_v44  ;;  %3089 = vmatmul.msk.f32.vlgmr.msra.gmra.mxu3 %vm577_vm1, %v557_v47 }
 0x17d   : > { %3078 = vmatmul.msk.f32.gmra.mxu0 %vm577_vm1, %v546_v45  ;;  %3090 = vmatmul.msk.f32.gmra.mxu3 %vm577_vm1, %v558_v49  ;;  %v3174_v49 = vld [vmem:[%s5232_s5 + $0x100] sm:$0xff] }
 0x185   : > { %3079 = vmatmul.msk.f32.gmra.mxu0 %vm577_vm1, %v547_v46  ;;  %3091 = vmatmul.msk.f32.gmra.mxu3 %vm577_vm1, %v559_v52  ;;  %v3175_v52 = vld [vmem:[%s5232_s5 + $0x108] sm:$0xff] }
 0x18d   : > { %3080 = vmatmul.msk.f32.gmra.mxu0 %vm577_vm1, %v548_v48  ;;  %3092 = vmatmul.msk.f32.gmra.mxu3 %vm577_vm1, %v560_v55  ;;  %v554_v48 = vld [vmem:[%s5232_s5 + $0x48] sm:$0xff]  ;;  %v3176_v55 = vld [vmem:[%s5232_s5 + $0x110] sm:$0xff] }
 0x191   : > { %v1205_v50 = vpop.f32.mrf.mxu1 }
 0x192   : > { %v1224_v43 = vmul.f32 %v3565_v32, %v1205_v50  ;;  %v564_v50 = vld [vmem:[%s5232_s5 + $0x98] sm:$0xff] }
 0x194   : > { %v1234_v47 = vadd.f32 %v3566_v33, %v1224_v43  ;;  %v574_v43 = vld [vmem:[%s5232_s5 + $0xe8] sm:$0xff] }
 0x195   : > { %3081 = vmatmul.msk.f32.gmra.mxu0 %vm577_vm1, %v549_v51  ;;  %3093 = vmatmul.msk.f32.gmra.mxu3 %vm577_vm1, %v561_v60  ;;  %v555_v51 = vld [vmem:[%s5232_s5 + $0x50] sm:$0xff]  ;;  %v568_v60 = vld [vmem:[%s5232_s5 + $0xb8] sm:$0xff] }
 0x199   : > { %v1207_v53 = vpop.f32.mrf.mxu1 }
 0x19a   : > { %v1225_v39 = vmul.f32 %v3565_v32, %v1207_v53  ;;  %v565_v53 = vld [vmem:[%s5232_s5 + $0xa0] sm:$0xff] }
 0x19c   : > { %v1235_v45 = vadd.f32 %v3566_v33, %v1225_v39 }
 0x19d   : > { %3082 = vmatmul.msk.f32.gmra.mxu0 %vm577_vm1, %v550_v54  ;;  %3094 = vmatmul.msk.f32.gmra.mxu3 %vm577_vm1, %v562_v63  ;;  %v556_v54 = vld [vmem:[%s5232_s5 + $0x58] sm:$0xff]  ;;  %v3179_v63 = vld [vmem:[%s5232_s5 + $0x128] sm:$0xff] }
 0x1a1   : > { %v1210_v58 = vpop.f32.mrf.mxu1 }
 0x1a2   : > { %v1226_v36 = vmul.f32 %v3565_v32, %v1210_v58  ;;  %v567_v58 = vld [vmem:[%s5232_s5 + $0xb0] sm:$0xff] }
 0x1a4   : > { %v1236_v44 = vadd.f32 %v3566_v33, %v1226_v36 }
 0x1a5   : > { %3083 = vmatmul.msk.f32.gmra.mxu0 %vm577_vm1, %v551_v59  ;;  %3095 = vmatmul.msk.f32.gmra.mxu3 %vm577_vm1, %v563_v42  ;;  %v3178_v59 = vld [vmem:[%s5232_s5 + $0x120] sm:$0xff]  ;;  %v3184_v42 = vld [vmem:[%s5232_s5 + $0x150] sm:$0xff] }
 0x1a9   : > { %v1212_v61 = vpop.f32.mrf.mxu1 }
 0x1aa   : > { %v1227_v34 = vmul.f32 %v3565_v32, %v1212_v61  ;;  %v3498_v61 = vld [vmem:[%s5234_s7] sm:$0xff] }
 0x1ab   : > { %1018 = vmatpush.bf16.msra.mxu0 %v3498_v61  ;;  %v3190_v61 = vld [vmem:[%s5232_s5 + $0x180] sm:$0xff] }
 0x1ac   : > { %v1237_v40 = vadd.f32 %v3566_v33, %v1227_v34  ;;  %v572_v34 = vld [vmem:[%s5232_s5 + $0xd8] sm:$0xff] }
 0x1ad   : > { %3084 = vmatmul.msk.f32.gmra.mxu0 %vm577_vm1, %v552_v62  ;;  %3096 = vmatmul.msk.f32.gmra.mxu3 %vm577_vm1, %v564_v50  ;;  %v391_v62 = vpack.c.bf16 %v3868_v28, %v3876_v30  ;;  %v3503_v50 = vld [vmem:[%s5233_s6 + $0x10] sm:$0xff] }
 0x1af   : > { %1726 = vmatpush.msrb.mxu0 %v3761_v1 }
 0x1b1   : > { %v1215_v35 = vpop.f32.mrf.mxu1  ;;  %1727 = vmatpush.msrb.mxu0 %v3769_v3 }
 0x1b2   : > { %v1228_v37 = vmul.f32 %v3565_v32, %v1215_v35  ;;  %v569_v32 = vld [vmem:[%s5232_s5 + $0xc0] sm:$0xff]  ;;  %v393_v35 = vpack.c.bf16 %v3836_v20, %v3844_v22 }
 0x1b3   : > { %1728 = vmatpush.msrb.mxu0 %v3775_v5 }
 0x1b4   : > { %v1238_v41 = vadd.f32 %v3566_v33, %v1228_v37  ;;  %v3182_v33 = vld [vmem:[%s5232_s5 + $0x140] sm:$0xff]  ;;  %v3183_v37 = vld [vmem:[%s5232_s5 + $0x148] sm:$0xff] }
 0x1b5   : > { %3085 = vmatmul.msk.f32.gmra.mxu0 %vm577_vm1, %v553_v38  ;;  %3097 = vmatmul.msk.f32.gmra.mxu3 %vm577_vm1, %v565_v53  ;;  %v573_v38 = vld [vmem:[%s5232_s5 + $0xe0] sm:$0xff] }
 0x1b6   : > { %1379 = vmatpush.msra.mxu1 %v1238_v41  ;;  %3517 = vmatpush.msra.mxu2 %v1238_v41 }
 0x1b7   : > { %1729 = vmatpush.msrb.mxu0 %v3783_v7 }
 0x1b8   : > { %1380 = vmatpush.msra.mxu1 %v1237_v40  ;;  %3518 = vmatpush.msra.mxu2 %v1237_v40 }
 0x1b9   : > { %v1217_v46 = vpop.f32.mrf.mxu1  ;;  %1730 = vmatpush.msrb.mxu0 %v3791_v9 }
 0x1ba   : > { %1381 = vmatpush.msra.mxu1 %v1236_v44  ;;  %3519 = vmatpush.msra.mxu2 %v1236_v44  ;;  %v394_v44 = vpack.c.bf16 %v3820_v16, %v3828_v18 }
 0x1bb   : > { %1731 = vmatpush.msrb.mxu0 %v3799_v11 }
 0x1bc   : > { %1382 = vmatpush.msra.mxu1 %v1235_v45  ;;  %3520 = vmatpush.msra.mxu2 %v1235_v45 }
 0x1bd   : > { %3086 = vmatmul.msk.f32.gmra.mxu0 %vm577_vm1, %v554_v48  ;;  %3098 = vmatmul.msk.f32.gmra.mxu3 %vm577_vm1, %v566_v56  ;;  %v575_v48 = vld [vmem:[%s5232_s5 + $0xf0] sm:$0xff]  ;;  %v3189_v56 = vld [vmem:[%s5232_s5 + $0x178] sm:$0xff] }
 0x1be   : > { %1383 = vmatpush.msra.mxu1 %v1234_v47  ;;  %3521 = vmatpush.msra.mxu2 %v1234_v47  ;;  %v3185_v47 = vld [vmem:[%s5232_s5 + $0x158] sm:$0xff] }
 0x1bf   : > { %3206 = vmatmul.msk.f32.vlgmr.msra.gmra.mxu1 %vm577_vm1, %v3174_v49  ;;  %1732 = vmatpush.msrb.mxu0 %v3807_v13  ;;  %v3186_v49 = vld [vmem:[%s5232_s5 + $0x160] sm:$0xff] }
 0x1c0   : > { %2277 = vmatpush.msrb.mxu1 %v3758_v0 }
 0x1c1   : > { %1733 = vmatpush.msrb.mxu0 %v3815_v15 }
 0x1c2   : > { %2278 = vmatpush.msrb.mxu1 %v3764_v2 }
 0x1c3   : > { %1734 = vmatpush.msrb.mxu0 %v3823_v17 }
 0x1c4   : > { %2279 = vmatpush.msrb.mxu1 %v3772_v4 }
 0x1c5   : > { %3087 = vmatmul.msk.f32.gmra.mxu0 %vm577_vm1, %v555_v51  ;;  %3099 = vmatmul.msk.f32.gmra.mxu3 %vm577_vm1, %v567_v58  ;;  %v3187_v51 = vld [vmem:[%s5232_s5 + $0x168] sm:$0xff] }
 0x1c6   : > { %2280 = vmatpush.msrb.mxu1 %v3780_v6  ;;  %1735 = vmatpush.msrb.mxu0 %v3831_v19 }
 0x1c7   : > { %3207 = vmatmul.msk.f32.gmra.mxu1 %vm577_vm1, %v3175_v52 }
 0x1c8   : > { %2281 = vmatpush.msrb.mxu1 %v3788_v8  ;;  %1736 = vmatpush.msrb.mxu0 %v3839_v21 }
 0x1ca   : > { %2282 = vmatpush.msrb.mxu1 %v3796_v10  ;;  %1737 = vmatpush.msrb.mxu0 %v3847_v23 }
 0x1cc   : > { %2283 = vmatpush.msrb.mxu1 %v3804_v12  ;;  %1738 = vmatpush.msrb.mxu0 %v3855_v25 }
 0x1cd   : > { %3088 = vmatmul.msk.f32.gmra.mxu0 %vm577_vm1, %v556_v54  ;;  %3100 = vmatmul.msk.f32.gmra.mxu3 %vm577_vm1, %v568_v60  ;;  %v396_v54 = vpack.c.bf16 %v3788_v8, %v3796_v10 }
 0x1ce   : > { %2284 = vmatpush.msrb.mxu1 %v3812_v14  ;;  %1739 = vmatpush.msrb.mxu0 %v3863_v27 }
 0x1cf   : > { %3208 = vmatmul.msk.f32.gmra.mxu1 %vm577_vm1, %v3176_v55 }
 0x1d0   : > { %2285 = vmatpush.msrb.mxu1 %v3820_v16  ;;  %1740 = vmatpush.msrb.mxu0 %v3871_v29 }
 0x1d2   : > { %2286 = vmatpush.msrb.mxu1 %v3828_v18  ;;  %1741 = vmatpush.msrb.mxu0 %v3879_v31 }
 0x1d4   : > { %2287 = vmatpush.msrb.mxu1 %v3836_v20 }
 0x1d5   : > { %3137 = vmatmul.msk.bf16.vlgmr.msra.gmra.mxu0 %vm494_vm0, %v391_v62  ;;  %3101 = vmatmul.msk.f32.gmra.mxu3 %vm577_vm1, %v569_v32  ;;  %v3191_v32 = vld [vmem:[%s5232_s5 + $0x188] sm:$0xff] }
 0x1d6   : > { %2288 = vmatpush.msrb.mxu1 %v3844_v22 }
 0x1d7   : > { %3209 = vmatmul.msk.f32.gmra.mxu1 %vm577_vm1, %v3177_v57 }
 0x1d8   : > { %2289 = vmatpush.msrb.mxu1 %v3852_v24 }
 0x1da   : > { %2290 = vmatpush.msrb.mxu1 %v3860_v26 }
 0x1dc   : > { %2291 = vmatpush.msrb.mxu1 %v3868_v28 }
 0x1de   : > { %2292 = vmatpush.msrb.mxu1 %v3876_v30 }
 0x1df   : > { %3210 = vmatmul.msk.f32.gmra.mxu1 %vm577_vm1, %v3178_v59 }
 0x1e0   : > { %2309 = vmatpush.msra.mxu1 %v3761_v1  ;;  %v3180_v1 = vld [vmem:[%s5232_s5 + $0x130] sm:$0xff] }
 0x1e2   : > { %2310 = vmatpush.msra.mxu1 %v3769_v3  ;;  %v570_v3 = vld [vmem:[%s5232_s5 + $0xc8] sm:$0xff] }
 0x1e3   : > { %3102 = vmatmul.msk.f32.gmra.mxu3 %vm577_vm1, %v570_v3 }
 0x1e4   : > { %2311 = vmatpush.msra.mxu1 %v3775_v5  ;;  %v392_v5 = vpack.c.bf16 %v3852_v24, %v3860_v26 }
 0x1e6   : > { %2312 = vmatpush.msra.mxu1 %v3783_v7  ;;  %3138 = vmatmul.msk.bf16.gmra.mxu0 %vm494_vm0, %v392_v5 }
 0x1e7   : > { %3211 = vmatmul.msk.f32.gmra.mxu1 %vm577_vm1, %v3179_v63 }
 0x1e8   : > { %2313 = vmatpush.msra.mxu1 %v3791_v9  ;;  %v3181_v9 = vld [vmem:[%s5232_s5 + $0x138] sm:$0xff] }
 0x1ea   : > { %2314 = vmatpush.msra.mxu1 %v3799_v11  ;;  %v571_v11 = vld [vmem:[%s5232_s5 + $0xd0] sm:$0xff] }
 0x1eb   : > { %3103 = vmatmul.msk.f32.gmra.mxu3 %vm577_vm1, %v571_v11 }
 0x1ec   : > { %2315 = vmatpush.msra.mxu1 %v3807_v13 }
 0x1ee   : > { %2316 = vmatpush.msra.mxu1 %v3815_v15 }
 0x1ef   : > { %3212 = vmatmul.msk.f32.gmra.mxu1 %vm577_vm1, %v3180_v1 }
 0x1f0   : > { %2317 = vmatpush.msra.mxu1 %v3823_v17 }
 0x1f2   : > { %v691_v7 = vpop.f32.mrf.mxu0  ;;  %2318 = vmatpush.msra.mxu1 %v3831_v19 }
 0x1f3   : > { %3104 = vmatmul.msk.f32.gmra.mxu3 %vm577_vm1, %v572_v34 }
 0x1f4   : > { %2319 = vmatpush.msra.mxu1 %v3839_v21 }
 0x1f6   : > { %2320 = vmatpush.msra.mxu1 %v3847_v23  ;;  %3139 = vmatmul.msk.bf16.gmra.mxu0 %vm494_vm0, %v393_v35 }
 0x1f7   : > { %3213 = vmatmul.msk.f32.gmra.mxu1 %vm577_vm1, %v3181_v9 }
 0x1f8   : > { %2321 = vmatpush.msra.mxu1 %v3855_v25  ;;  %v4230_v40 = vpop.f32.mrf.mxu3 }
 0x1fa   : > { %v694_v13 = vpop.f32.mrf.mxu0  ;;  %2322 = vmatpush.msra.mxu1 %v3863_v27 }
 0x1fb   : > { %v787_v15 = vpack.c.bf16 %v694_v13, %v691_v7  ;;  %3105 = vmatmul.msk.f32.gmra.mxu3 %vm577_vm1, %v573_v38  ;;  %v3195_v38 = vld [vmem:[%s5232_s5 + $0x1a8] sm:$0xff] }
 0x1fc   : > { %2323 = vmatpush.msra.mxu1 %v3871_v29 }
 0x1fd   : > { %3117 = vmatmul.msk.bf16.vlgmr.msrb.gmra.mxu2 %vm819_vm2, %v787_v15  ;;  %v3193_v15 = vld [vmem:[%s5232_s5 + $0x198] sm:$0xff] }
 0x1fe   : > { %2324 = vmatpush.msra.mxu1 %v3879_v31  ;;  %1694 = vmatpush.msrb.mxu2 %v3758_v0 }
 0x1ff   : > { %3214 = vmatmul.msk.f32.gmra.mxu1 %vm577_vm1, %v3182_v33 }
 0x200   : > { %1695 = vmatpush.msrb.mxu2 %v3764_v2  ;;  %v4247_v46 = vpop.f32.mrf.mxu3 }
 0x201   : > { %v793_v34 = vpack.c.bf16 %v4247_v46, %v4230_v40  ;;  %v3197_v46 = vld [vmem:[%s5232_s5 + $0x1b8] sm:$0xff] }
 0x202   : > { %v697_v36 = vpop.f32.mrf.mxu0  ;;  %1696 = vmatpush.msrb.mxu2 %v3772_v4 }
 0x203   : > { %3106 = vmatmul.msk.f32.gmra.mxu3 %vm577_vm1, %v574_v43 }
 0x204   : > { %1697 = vmatpush.msrb.mxu2 %v3780_v6 }
 0x206   : > { %1698 = vmatpush.msrb.mxu2 %v3788_v8  ;;  %3140 = vmatmul.msk.bf16.gmra.mxu0 %vm494_vm0, %v394_v44  ;;  %v400_v44 = vpack.c.bf16 %v3855_v25, %v3863_v27 }
 0x207   : > { %3215 = vmatmul.msk.f32.gmra.mxu1 %vm577_vm1, %v3183_v37 }
 0x208   : > { %1699 = vmatpush.msrb.mxu2 %v3796_v10  ;;  %v397_v10 = vpack.c.bf16 %v3772_v4, %v3780_v6  ;;  %v3192_v4 = vld [vmem:[%s5232_s5 + $0x190] sm:$0xff]  ;;  %v398_v6 = vpack.c.bf16 %v3758_v0, %v3764_v2  ;;  %v3194_v0 = vld [vmem:[%s5232_s5 + $0x1a0] sm:$0xff] }
 0x20a   : > { %v700_v39 = vpop.f32.mrf.mxu0  ;;  %1700 = vmatpush.msrb.mxu2 %v3804_v12 }
 0x20b   : > { %v788_v41 = vpack.c.bf16 %v700_v39, %v697_v36  ;;  %3107 = vmatmul.msk.f32.gmra.mxu3 %vm577_vm1, %v575_v48  ;;  %v399_v36 = vpack.c.bf16 %v3871_v29, %v3879_v31  ;;  %v3196_v29 = vld [vmem:[%s5232_s5 + $0x1b0] sm:$0xff] }
 0x20c   : > { %1701 = vmatpush.msrb.mxu2 %v3812_v14 }
 0x20d   : > { %3118 = vmatmul.msk.bf16.gmra.mxu2 %vm819_vm2, %v788_v41 }
 0x20e   : > { %1702 = vmatpush.msrb.mxu2 %v3820_v16 }
 0x20f   : > { %3216 = vmatmul.msk.f32.gmra.mxu1 %vm577_vm1, %v3184_v42 }
 0x210   : > { %1703 = vmatpush.msrb.mxu2 %v3828_v18  ;;  %v4262_v18 = vpop.f32.mrf.mxu3 }
 0x212   : > { %v703_v45 = vpop.f32.mrf.mxu0  ;;  %1704 = vmatpush.msrb.mxu2 %v3836_v20 }
 0x214   : > { %1705 = vmatpush.msrb.mxu2 %v3844_v22  ;;  %v576_v22 = vld [vmem:[%s5232_s5 + $0xf8] sm:$0xff] }
 0x215   : > { %3108 = vmatmul.msk.f32.gmra.mxu3 %vm577_vm1, %v576_v22 }
 0x216   : > { %1706 = vmatpush.msrb.mxu2 %v3852_v24  ;;  %v3504_v24 = vld [vmem:[%s5233_s6 + $0x18] sm:$0xff] }
 0x217   : > { %3217 = vmatmul.msk.f32.gmra.mxu1 %vm577_vm1, %v3185_v47  ;;  %1568 = vmatpush.bf16.msrb.mxu3 %v3504_v24 }
 0x218   : > { %1707 = vmatpush.msrb.mxu2 %v3860_v26  ;;  %v395_v26 = vpack.c.bf16 %v3804_v12, %v3812_v14  ;;  %v3188_v14 = vld [vmem:[%s5232_s5 + $0x170] sm:$0xff] }
 0x21a   : > { %v706_v16 = vpop.f32.mrf.mxu0  ;;  %1708 = vmatpush.msrb.mxu2 %v3868_v28  ;;  %3141 = vmatmul.msk.bf16.gmra.mxu0 %vm494_vm0, %v395_v26 }
 0x21b   : > { %v789_v20 = vpack.c.bf16 %v706_v16, %v703_v45  ;;  %1569 = vmatpush.bf16.msrb.mxu3 %v3503_v50 }
 0x21c   : > { %1709 = vmatpush.msrb.mxu2 %v3876_v30  ;;  %v4280_v30 = vpop.f32.mrf.mxu3 }
 0x21d   : > { %3119 = vmatmul.msk.bf16.gmra.mxu2 %vm819_vm2, %v789_v20  ;;  %v794_v41 = vpack.c.bf16 %v4280_v30, %v4262_v18 }
 0x21f   : > { %3218 = vmatmul.msk.f32.gmra.mxu1 %vm577_vm1, %v3186_v49  ;;  %v401_v49 = vpack.c.bf16 %v3839_v21, %v3847_v23 }
 0x222   : > { %v709_v28 = vpop.f32.mrf.mxu0 }
 0x224   : > { %v4290_v53 = vpop.f32.mrf.mxu3 }
 0x227   : > { %3219 = vmatmul.msk.f32.gmra.mxu1 %vm577_vm1, %v3187_v51 }
 0x22a   : > { %v712_v52 = vpop.f32.mrf.mxu0  ;;  %3142 = vmatmul.msk.bf16.gmra.mxu0 %vm494_vm0, %v396_v54 }
 0x22b   : > { %v790_v12 = vpack.c.bf16 %v712_v52, %v709_v28 }
 0x22c   : > { %v4303_v57 = vpop.f32.mrf.mxu3 }
 0x22d   : > { %3120 = vmatmul.msk.bf16.gmra.mxu2 %vm819_vm2, %v790_v12  ;;  %v795_v18 = vpack.c.bf16 %v4303_v57, %v4290_v53 }
 0x22f   : > { %3220 = vmatmul.msk.f32.gmra.mxu1 %vm577_vm1, %v3188_v14  ;;  %v402_v14 = vpack.c.bf16 %v3823_v17, %v3831_v19  ;;  %v3573_v19 = vld [vmem:[%s3755_s29 + $0xc8] sm:$0xff] }
 0x232   : > { %v715_v55 = vpop.f32.mrf.mxu0 }
 0x234   : > { %v4310_v8 = vpop.f32.mrf.mxu3 }
 0x237   : > { %3221 = vmatmul.msk.f32.gmra.mxu1 %vm577_vm1, %v3189_v56 }
 0x23a   : > { %v718_v58 = vpop.f32.mrf.mxu0  ;;  %3143 = vmatmul.msk.bf16.gmra.mxu0 %vm494_vm0, %v397_v10 }
 0x23b   : > { %v791_v59 = vpack.c.bf16 %v718_v58, %v715_v55 }
 0x23c   : > { %v1385_v60 = vpop.f32.mrf.mxu1  ;;  %v748_v3 = vpop.f32.mrf.mxu3 }
 0x23d   : > { %3121 = vmatmul.msk.bf16.gmra.mxu2 %vm819_vm2, %v791_v59  ;;  %v796_v51 = vpack.c.bf16 %v748_v3, %v4310_v8 }
 0x23f   : > { %3222 = vmatmul.msk.f32.gmra.mxu1 %vm577_vm1, %v3190_v61 }
 0x242   : > { %v721_v62 = vpop.f32.mrf.mxu0 }
 0x244   : > { %v1388_v63 = vpop.f32.mrf.mxu1  ;;  %v4328_v11 = vpop.f32.mrf.mxu3 }
 0x245   : > { %v1481_v1 = vpack.c.bf16 %v1388_v63, %v1385_v60 }
 0x247   : > { %3223 = vmatmul.msk.f32.gmra.mxu1 %vm577_vm1, %v3191_v32  ;;  %3250 = vmatmul.msk.bf16.vlgmr.msrb.gmra.mxu3 %vm819_vm2, %v1481_v1 }
 0x24a   : > { %v724_v5 = vpop.f32.mrf.mxu0  ;;  %3144 = vmatmul.msk.bf16.gmra.mxu0 %vm494_vm0, %v398_v6 }
 0x24b   : > { %v792_v7 = vpack.c.bf16 %v724_v5, %v721_v62  ;;  %v3574_v62 = vld [vmem:[%s3755_s29 + $0xc0] sm:$0xff] }
 0x24c   : > { %v1391_v9 = vpop.f32.mrf.mxu1  ;;  %v754_v2 = vpop.f32.mrf.mxu3  ;;  %v403_v63 = vpack.c.bf16 %v3573_v19, %v3574_v62 }
 0x24d   : > { %3122 = vmatmul.msk.bf16.gmra.mxu2 %vm819_vm2, %v792_v7  ;;  %v797_v60 = vpack.c.bf16 %v754_v2, %v4328_v11 }
 0x24f   : > { %3224 = vmatmul.msk.f32.gmra.mxu1 %vm577_vm1, %v3192_v4 }
 0x252   : > { %v1020_v31 = vpop.f32.mrf.mxu0 }
 0x254   : > { %v1394_v13 = vpop.f32.mrf.mxu1  ;;  %v4349_v40 = vpop.f32.mrf.mxu3 }
 0x255   : > { %v1482_v33 = vpack.c.bf16 %v1394_v13, %v1391_v9 }
 0x257   : > { %3225 = vmatmul.msk.f32.gmra.mxu1 %vm577_vm1, %v3193_v15  ;;  %3251 = vmatmul.msk.bf16.gmra.mxu3 %vm819_vm2, %v1482_v33  ;;  %v3575_v33 = vld [vmem:[%s3755_s29 + $0xd8] sm:$0xff] }
 0x25a   : > { %3145 = vmatmul.msk.bf16.gmra.mxu0 %vm494_vm0, %v399_v36  ;;  %v1022_v48 = vpop.f32.mrf.mxu0 }
 0x25c   : > { %v1397_v35 = vpop.f32.mrf.mxu1  ;;  %v760_v43 = vpop.f32.mrf.mxu3 }
 0x25d   : > { %3123 = vmatmul.msk.bf16.gmra.mxu2 %vm819_vm2, %v793_v34  ;;  %v798_v9 = vpack.c.bf16 %v760_v43, %v4349_v40  ;;  %v3576_v34 = vld [vmem:[%s3755_s29 + $0xd0] sm:$0xff]  ;;  %v3578_v43 = vld [vmem:[%s3755_s29 + $0xe0] sm:$0xff] }
 0x25f   : > { %3226 = vmatmul.msk.f32.gmra.mxu1 %vm577_vm1, %v3194_v0 }
 0x263   : > { %v1025_v22 = vpop.f32.mrf.mxu0 }
 0x264   : > { %v1400_v37 = vpop.f32.mrf.mxu1  ;;  %v4368_v16 = vpop.f32.mrf.mxu3 }
 0x265   : > { %v1483_v39 = vpack.c.bf16 %v1400_v37, %v1397_v35  ;;  %v404_v35 = vpack.c.bf16 %v3575_v33, %v3576_v34 }
 0x267   : > { %3227 = vmatmul.msk.f32.gmra.mxu1 %vm577_vm1, %v3195_v38  ;;  %3252 = vmatmul.msk.bf16.gmra.mxu3 %vm819_vm2, %v1483_v39 }
 0x26a   : > { %3146 = vmatmul.msk.bf16.gmra.mxu0 %vm494_vm0, %v400_v44 }
 0x26b   : > { %v1027_v53 = vpop.f32.mrf.mxu0 }
 0x26c   : > { %v1403_v42 = vpop.f32.mrf.mxu1  ;;  %v766_v26 = vpop.f32.mrf.mxu3 }
 0x26d   : > { %3124 = vmatmul.msk.bf16.gmra.mxu2 %vm819_vm2, %v794_v41  ;;  %v799_v40 = vpack.c.bf16 %v766_v26, %v4368_v16  ;;  %v3579_v26 = vld [vmem:[%s3755_s29 + $0xf8] sm:$0xff] }
 0x26f   : > { %3228 = vmatmul.msk.f32.gmra.mxu1 %vm577_vm1, %v3196_v29 }
 0x273   : > { %v1030_v56 = vpop.f32.mrf.mxu0 }
 0x274   : > { %v1406_v45 = vpop.f32.mrf.mxu1  ;;  %v4383_v12 = vpop.f32.mrf.mxu3 }
 0x275   : > { %v1484_v47 = vpack.c.bf16 %v1406_v45, %v1403_v42 }
 0x277   : > { %3229 = vmatmul.msk.f32.gmra.mxu1 %vm577_vm1, %v3197_v46  ;;  %3253 = vmatmul.msk.bf16.gmra.mxu3 %vm819_vm2, %v1484_v47 }
 0x27a   : > { %3147 = vmatmul.msk.bf16.gmra.mxu0 %vm494_vm0, %v401_v49  ;;  %v3379_v49 = vld [vmem:[%s5228_s1 + $0xf0] sm:$0xff] }
 0x27b   : > { %v1032_v17 = vpop.f32.mrf.mxu0 }
 0x27c   : > { %v1409_v20 = vpop.f32.mrf.mxu1  ;;  %v772_v58 = vpop.f32.mrf.mxu3 }
 0x27d   : > { %3125 = vmatmul.msk.bf16.gmra.mxu2 %vm819_vm2, %v795_v18  ;;  %v800_v18 = vpack.c.bf16 %v772_v58, %v4383_v12 }
 0x27f   : > { %2293 = vmatmul.f32.vlgmr.msrb.gmra.mxu1 %v3379_v49 }
 0x280   : > { %v877_v25 = vpop.f32.mrf.mxu2 }
 0x281   : > { %v4373_v27 = vadd.f32 %v1020_v31, %v877_v25  ;;  %v3577_v31 = vld [vmem:[%s3755_s29 + $0xe8] sm:$0xff] }
 0x282   : > { %v405_v44 = vpack.c.bf16 %v3577_v31, %v3578_v43 }
 0x283   : > { %v1035_v4 = vpop.f32.mrf.mxu0 }
 0x284   : > { %v1412_v24 = vpop.f32.mrf.mxu1  ;;  %v4399_v32 = vpop.f32.mrf.mxu3 }
 0x285   : > { %v1485_v28 = vpack.c.bf16 %v1412_v24, %v1409_v20 }
 0x287   : > { %3254 = vmatmul.msk.bf16.gmra.mxu3 %vm819_vm2, %v1485_v28  ;;  %v3580_v28 = vld [vmem:[%s3755_s29 + $0xf0] sm:$0xff]  ;;  %s2998_s29 = sshll.u32 %s5016_s21, 4  ;;  %s2999_s29 = int_to_ptr.vmem [resolvable:$true] %s2998_s29 }
 0x288   : > { %v879_v30 = vpop.f32.mrf.mxu2 }
 0x289   : > { %v4379_v50 = vadd.f32 %v1022_v48, %v879_v30  ;;  %v406_v30 = vpack.c.bf16 %v3579_v26, %v3580_v28  ;;  %v3202_v28 = vld [vmem:[%s5232_s5 + $0x1e0] sm:$0xff] }
 0x28a   : > { %3148 = vmatmul.msk.bf16.gmra.mxu0 %vm494_vm0, %v402_v14 }
 0x28b   : > { %v1037_v36 = vpop.f32.mrf.mxu0 }
 0x28c   : > { %v1415_v52 = vpop.f32.mrf.mxu1  ;;  %v778_v11 = vpop.f32.mrf.mxu3 }
 0x28d   : > { %3126 = vmatmul.msk.bf16.gmra.mxu2 %vm819_vm2, %v796_v51 }
 0x290   : > { %v882_v21 = vpop.f32.mrf.mxu2 }
 0x291   : > { %v4385_v23 = vadd.f32 %v1025_v22, %v882_v21  ;;  %v3508_v22 = vld [vmem:[%s5229_s2 + $0x18] sm:$0xff] }
 0x292   : > { %2369 = vmatpush.bf16.msra.mxu3 %v3508_v22 }
 0x294   : > { %v1418_v54 = vpop.f32.mrf.mxu1  ;;  %v4412_v37 = vpop.f32.mrf.mxu3 }
 0x295   : > { %v1486_v55 = vpack.c.bf16 %v1418_v54, %v1415_v52  ;;  %v801_v54 = vpack.c.bf16 %v778_v11, %v4399_v32 }
 0x297   : > { %3255 = vmatmul.msk.bf16.gmra.mxu3 %vm819_vm2, %v1486_v55  ;;  %v4427_v48 = vpop.f32.mrf.mxu0 }
 0x298   : > { %v884_v57 = vpop.f32.mrf.mxu2 }
 0x299   : > { %v4391_v59 = vadd.f32 %v1027_v53, %v884_v57  ;;  %v3381_v53 = vld [vmem:[%s5228_s1 + $0x100] sm:$0xff]  ;;  %v3383_v57 = vld [vmem:[%s5228_s1 + $0x110] sm:$0xff] }
 0x29a   : > { %3149 = vmatmul.msk.bf16.gmra.mxu0 %vm494_vm0, %v403_v63  ;;  %2296 = vmatmul.f32.gmra.mxu1 %v3381_v53 }
 0x29c   : > { %v1421_v61 = vpop.f32.mrf.mxu1  ;;  %v784_v29 = vpop.f32.mrf.mxu3 }
 0x29d   : > { %3127 = vmatmul.msk.bf16.gmra.mxu2 %vm819_vm2, %v797_v60  ;;  %v802_v32 = vpack.c.bf16 %v784_v29, %v4412_v37 }
 0x29f   : > { %v4447_v51 = vpop.f32.mrf.mxu0 }
 0x2a0   : > { %v887_v8 = vpop.f32.mrf.mxu2 }
 0x2a1   : > { %v4395_v10 = vadd.f32 %v1030_v56, %v887_v8 }
 0x2a2   : > { %2299 = vmatmul.f32.gmra.mxu1 %v3383_v57 }
 0x2a4   : > { %v1424_v1 = vpop.f32.mrf.mxu1 }
 0x2a5   : > { %v1487_v3 = vpack.c.bf16 %v1424_v1, %v1421_v61 }
 0x2a7   : > { %3256 = vmatmul.msk.bf16.gmra.mxu3 %vm819_vm2, %v1487_v3  ;;  %v1045_v58 = vpop.f32.mrf.mxu0 }
 0x2a8   : > { %v889_v5 = vpop.f32.mrf.mxu2 }
 0x2a9   : > { %v4403_v7 = vadd.f32 %v1032_v17, %v889_v5  ;;  %v3385_v17 = vld [vmem:[%s5228_s1 + $0x120] sm:$0xff]  ;;  %v3387_v5 = vld [vmem:[%s5228_s1 + $0x130] sm:$0xff] }
 0x2aa   : > { %3150 = vmatmul.msk.bf16.gmra.mxu0 %vm494_vm0, %v404_v35  ;;  %2302 = vmatmul.f32.gmra.mxu1 %v3385_v17  ;;  %v3198_v35 = vld [vmem:[%s5232_s5 + $0x1c0] sm:$0xff]  ;;  %v3269_v17 = vld [vmem:[%s5228_s1 + $0xb8] sm:$0xff] }
 0x2ac   : > { %v1427_v6 = vpop.f32.mrf.mxu1 }
 0x2ad   : > { %3128 = vmatmul.msk.bf16.gmra.mxu2 %vm819_vm2, %v798_v9 }
 0x2af   : > { %v4471_v19 = vpop.f32.mrf.mxu0 }
 0x2b0   : > { %v892_v13 = vpop.f32.mrf.mxu2 }
 0x2b1   : > { %v4407_v15 = vadd.f32 %v1035_v4, %v892_v13  ;;  %v3380_v13 = vld [vmem:[%s5228_s1 + $0xf8] sm:$0xff] }
 0x2b2   : > { %2305 = vmatmul.f32.gmra.mxu1 %v3387_v5  ;;  %v3271_v5 = vld [vmem:[%s5228_s1 + $0xc8] sm:$0xff] }
 0x2b4   : > { %v1430_v0 = vpop.f32.mrf.mxu1 }
 0x2b5   : > { %v1488_v2 = vpack.c.bf16 %v1430_v0, %v1427_v6 }
 0x2b7   : > { %3257 = vmatmul.msk.bf16.gmra.mxu3 %vm819_vm2, %v1488_v2  ;;  %v1050_v4 = vpop.f32.mrf.mxu0 }
 0x2b8   : > { %v894_v38 = vpop.f32.mrf.mxu2 }
 0x2b9   : > { %v4415_v39 = vadd.f32 %v1037_v36, %v894_v38  ;;  %v3382_v36 = vld [vmem:[%s5228_s1 + $0x108] sm:$0xff] }
 0x2ba   : > { %3151 = vmatmul.msk.bf16.gmra.mxu0 %vm494_vm0, %v405_v44  ;;  %2325 = vmatmul.f32.vlgmr.msra.gmra.mxu1 %v3380_v13  ;;  %v3200_v44 = vld [vmem:[%s5232_s5 + $0x1d0] sm:$0xff] }
 0x2bc   : > { %v1433_v41 = vpop.f32.mrf.mxu1 }
 0x2bd   : > { %3129 = vmatmul.msk.bf16.gmra.mxu2 %vm819_vm2, %v799_v40  ;;  %v3199_v40 = vld [vmem:[%s5232_s5 + $0x1c8] sm:$0xff] }
 0x2bf   : > { %v4499_v2 = vpop.f32.mrf.mxu0 }
 0x2c0   : > { %v4419_v42 = vpop.f32.mrf.mxu2 }
 0x2c1   : > { %v1041_v31 = vadd.f32 %v4427_v48, %v4419_v42  ;;  %v3201_v42 = vld [vmem:[%s5232_s5 + $0x1d8] sm:$0xff] }
 0x2c2   : > { %2328 = vmatmul.f32.gmra.mxu1 %v3382_v36 }
 0x2c4   : > { %v1436_v45 = vpop.f32.mrf.mxu1 }
 0x2c5   : > { %v1489_v46 = vpack.c.bf16 %v1436_v45, %v1433_v41 }
 0x2c7   : > { %3258 = vmatmul.msk.bf16.gmra.mxu3 %vm819_vm2, %v1489_v46  ;;  %v1055_v41 = vpop.f32.mrf.mxu0  ;;  %v3386_v46 = vld [vmem:[%s5228_s1 + $0x128] sm:$0xff] }
 0x2c8   : > { %v4425_v47 = vpop.f32.mrf.mxu2 }
 0x2ca   : > { %v1571_v16 = vpop.f32.mrf.mxu3  ;;  %3152 = vmatmul.msk.bf16.gmra.mxu0 %vm494_vm0, %v406_v30 }
 0x2cb   : > { %v4431_v20 = vadd.f32 %v1571_v16, %v4373_v27 }
 0x2cc   : > { %v1439_v25 = vpop.f32.mrf.mxu1 }
 0x2cd   : > { %3130 = vmatmul.msk.bf16.gmra.mxu2 %vm819_vm2, %v800_v18 }
 0x2cf   : > { %v4529_v16 = vpop.f32.mrf.mxu0 }
 0x2d0   : > { %v4440_v24 = vpop.f32.mrf.mxu2 }
 0x2d1   : > { %v1046_v49 = vadd.f32 %v1045_v58, %v4440_v24  ;;  %v3203_v24 = vld [vmem:[%s5232_s5 + $0x1e8] sm:$0xff] }
 0x2d2   : > { %v4444_v27 = vpop.f32.mrf.mxu3 }
 0x2d4   : > { %v1442_v52 = vpop.f32.mrf.mxu1 }
 0x2d5   : > { %v1490_v12 = vpack.c.bf16 %v1442_v52, %v1439_v25  ;;  %v3388_v52 = vld [vmem:[%s5228_s1 + $0x138] sm:$0xff] }
 0x2d7   : > { %3259 = vmatmul.msk.bf16.gmra.mxu3 %vm819_vm2, %v1490_v12  ;;  %v1060_v22 = vpop.f32.mrf.mxu0 }
 0x2d8   : > { %v4453_v21 = vpop.f32.mrf.mxu2 }
 0x2da   : > { %v1576_v14 = vpop.f32.mrf.mxu3 }
 0x2db   : > { %v4457_v55 = vadd.f32 %v1576_v14, %v4385_v23  ;;  %v3267_v14 = vld [vmem:[%s5228_s1 + $0xa8] sm:$0xff] }
 0x2dc   : > { %v1445_v56 = vpop.f32.mrf.mxu1  ;;  %1742 = vmatmul.f32.vlgmr.msrb.gmra.mxu0 %v3267_v14 }
 0x2dd   : > { %3131 = vmatmul.msk.bf16.gmra.mxu2 %vm819_vm2, %v801_v54 }
 0x2df   : > { %v4559_v54 = vpop.f32.mrf.mxu0 }
 0x2e0   : > { %v4463_v60 = vpop.f32.mrf.mxu2 }
 0x2e1   : > { %v1051_v57 = vadd.f32 %v1050_v4, %v4463_v60  ;;  %v3205_v60 = vld [vmem:[%s5232_s5 + $0x1f8] sm:$0xff] }
 0x2e2   : > { %v4465_v61 = vpop.f32.mrf.mxu3 }
 0x2e4   : > { %v1448_v8 = vpop.f32.mrf.mxu1  ;;  %1745 = vmatmul.f32.gmra.mxu0 %v3269_v17 }
 0x2e5   : > { %v1491_v23 = vpack.c.bf16 %v1448_v8, %v1445_v56  ;;  %v3204_v8 = vld [vmem:[%s5232_s5 + $0x1f0] sm:$0xff] }
 0x2e7   : > { %3260 = vmatmul.msk.bf16.gmra.mxu3 %vm819_vm2, %v1491_v23 }
 0x2e8   : > { %v4473_v62 = vpop.f32.mrf.mxu2 }
 0x2ea   : > { %v1581_v63 = vpop.f32.mrf.mxu3 }
 0x2eb   : > { %v4477_v1 = vadd.f32 %v1581_v63, %v4395_v10  ;;  %v1065_v63 = vpop.f32.mrf.mxu0 }
 0x2ec   : > { %v1451_v3 = vpop.f32.mrf.mxu1  ;;  %1748 = vmatmul.f32.gmra.mxu0 %v3271_v5 }
 0x2ed   : > { %3132 = vmatmul.msk.bf16.gmra.mxu2 %vm819_vm2, %v802_v32 }
 0x2f0   : > { %v4483_v9 = vpop.f32.mrf.mxu2 }
 0x2f1   : > { %v1056_v13 = vadd.f32 %v1055_v41, %v4483_v9  ;;  %v3268_v9 = vld [vmem:[%s5228_s1 + $0xb0] sm:$0xff] }
 0x2f2   : > { %v4485_v6 = vpop.f32.mrf.mxu3 }
 0x2f3   : > { %v4585_v4 = vpop.f32.mrf.mxu0 }
 0x2f4   : > { %v1454_v11 = vpop.f32.mrf.mxu1  ;;  %5242 = vst [vmem:[#allocation7_spill] sm:$0xff] %v4585_v4 }
 0x2f5   : > { %v1492_v10 = vpack.c.bf16 %v1454_v11, %v1451_v3 }
 0x2f7   : > { %3261 = vmatmul.msk.bf16.gmra.mxu3 %vm819_vm2, %v1492_v10 }
 0x2f8   : > { %v4491_v33 = vpop.f32.mrf.mxu2 }
 0x2fa   : > { %v1586_v34 = vpop.f32.mrf.mxu3 }
 0x2fb   : > { %v4497_v0 = vadd.f32 %v1586_v34, %v4407_v15  ;;  %v3384_v15 = vld [vmem:[%s5228_s1 + $0x118] sm:$0xff]  ;;  %v3266_v34 = vld [vmem:[%s5228_s1 + $0xa0] sm:$0xff] }
 0x2fc   : > { %2331 = vmatmul.f32.gmra.mxu1 %v3384_v15  ;;  %v1070_v15 = vpop.f32.mrf.mxu0 }
 0x2fd   : > { %3230 = vmatmul.msk.f32.vlgmr.msra.gmra.mxu2 %vm577_vm1, %v3198_v35  ;;  %v3273_v35 = vld [vmem:[%s5228_s1 + $0xd8] sm:$0xff] }
 0x2fe   : > { %1751 = vmatmul.f32.gmra.mxu0 %v3273_v35 }
 0x300   : > { %v4505_v37 = vpop.f32.mrf.mxu2 }
 0x302   : > { %v4507_v38 = vpop.f32.mrf.mxu3 }
 0x304   : > { %2334 = vmatmul.f32.gmra.mxu1 %v3386_v46  ;;  %v3270_v46 = vld [vmem:[%s5228_s1 + $0xc0] sm:$0xff] }
 0x305   : > { %3231 = vmatmul.msk.f32.gmra.mxu2 %vm577_vm1, %v3199_v40 }
 0x308   : > { %v4516_v29 = vpop.f32.mrf.mxu2 }
 0x30a   : > { %v1591_v43 = vpop.f32.mrf.mxu3 }
 0x30b   : > { %v4523_v45 = vadd.f32 %v1591_v43, %v1041_v31  ;;  %v1061_v43 = vadd.f32 %v1060_v22, %v4505_v37  ;;  %v3272_v37 = vld [vmem:[%s5228_s1 + $0xd0] sm:$0xff] }
 0x30c   : > { %2337 = vmatmul.f32.gmra.mxu1 %v3388_v52 }
 0x30d   : > { %3232 = vmatmul.msk.f32.gmra.mxu2 %vm577_vm1, %v3200_v44 }
 0x310   : > { %v4531_v18 = vpop.f32.mrf.mxu2 }
 0x311   : > { %v1066_v14 = vadd.f32 %v1065_v63, %v4531_v18 }
 0x312   : > { %v4533_v25 = vpop.f32.mrf.mxu3 }
 0x315   : > { %3233 = vmatmul.msk.f32.gmra.mxu2 %vm577_vm1, %v3201_v42  ;;  %v3275_v42 = vld [vmem:[%s5228_s1 + $0xe8] sm:$0xff] }
 0x316   : > { %1754 = vmatmul.f32.gmra.mxu0 %v3275_v42  ;;  %v2294_v42 = vpop.f32.mrf.mxu1 }
 0x318   : > { %v4539_v48 = vpop.f32.mrf.mxu2 }
 0x31a   : > { %v1596_v26 = vpop.f32.mrf.mxu3 }
 0x31b   : > { %v4545_v30 = vadd.f32 %v1596_v26, %v1046_v49  ;;  %v4616_v26 = vpop.f32.mrf.mxu0 }
 0x31c   : > { %5246 = vst [vmem:[#allocation11_spill] sm:$0xff] %v4616_v26 }
 0x31d   : > { %3234 = vmatmul.msk.f32.gmra.mxu2 %vm577_vm1, %v3202_v28 }
 0x320   : > { %v927_v53 = vpop.f32.mrf.mxu2 }
 0x322   : > { %v4551_v12 = vpop.f32.mrf.mxu3 }
 0x323   : > { %v4625_v22 = vpop.f32.mrf.mxu0 }
 0x324   : > { %5248 = vst [vmem:[#allocation13_spill] sm:$0xff] %v4625_v22 }
 0x325   : > { %3235 = vmatmul.msk.f32.gmra.mxu2 %vm577_vm1, %v3203_v24 }
 0x328   : > { %v4562_v56 = vpop.f32.mrf.mxu2 }
 0x329   : > { %5240 = vst [vmem:[#allocation5_spill] sm:$0xff] %v4562_v56 }
 0x32a   : > { %v1601_v58 = vpop.f32.mrf.mxu3 }
 0x32b   : > { %v4571_v23 = vadd.f32 %v1601_v58, %v1051_v57  ;;  %v3274_v58 = vld [vmem:[%s5228_s1 + $0xe0] sm:$0xff]  ;;  %v4635_v17 = vpop.f32.mrf.mxu0 }
 0x32c   : > { %5250 = vst [vmem:[#allocation15_spill] sm:$0xff] %v4635_v17 }
 0x32d   : > { %3236 = vmatmul.msk.f32.gmra.mxu2 %vm577_vm1, %v3204_v8 }
 0x330   : > { %v4574_v32 = vpop.f32.mrf.mxu2 }
 0x331   : > { %5241 = vst [vmem:[#allocation6_spill] sm:$0xff] %v4574_v32 }
 0x332   : > { %v4576_v3 = vpop.f32.mrf.mxu3 }
 0x335   : > { %3237 = vmatmul.msk.f32.gmra.mxu2 %vm577_vm1, %v3205_v60 }
 0x338   : > { %v4587_v11 = vpop.f32.mrf.mxu2 }
 0x339   : > { %5243 = vst [vmem:[#allocation8_spill] sm:$0xff] %v4587_v11 }
 0x33a   : > { %v1606_v10 = vpop.f32.mrf.mxu3 }
 0x33b   : > { %v4596_v36 = vadd.f32 %v1606_v10, %v1056_v13  ;;  %v1071_v10 = vadd.f32 %v1070_v15, %v927_v53  ;;  %v2297_v53 = vpop.f32.mrf.mxu1 }
 0x33d   : > { %1710 = vmatmul.f32.vlgmr.msrb.gmra.mxu2 %v3266_v34  ;;  %v4643_v34 = vpop.f32.mrf.mxu0 }
 0x33e   : > { %5254 = vst [vmem:[#allocation19_spill] sm:$0xff] %v4643_v34 }
 0x340   : > { %v4598_v40 = vpop.f32.mrf.mxu2 }
 0x341   : > { %5244 = vst [vmem:[#allocation9_spill] sm:$0xff] %v4598_v40 }
 0x342   : > { %v4600_v31 = vpop.f32.mrf.mxu3 }
 0x345   : > { %1713 = vmatmul.f32.gmra.mxu2 %v3268_v9  ;;  %v4649_v9 = vpop.f32.mrf.mxu0 }
 0x346   : > { %5257 = vst [vmem:[#allocation22_spill] sm:$0xff] %v4649_v9 }
 0x348   : > { %v4605_v41 = vpop.f32.mrf.mxu2 }
 0x349   : > { %5245 = vst [vmem:[#allocation10_spill] sm:$0xff] %v4605_v41 }
 0x34a   : > { %v1611_v44 = vpop.f32.mrf.mxu3 }
 0x34b   : > { %v4614_v49 = vadd.f32 %v1611_v44, %v1061_v43 }
 0x34d   : > { %1716 = vmatmul.f32.gmra.mxu2 %v3270_v46  ;;  %v4653_v44 = vpop.f32.mrf.mxu0 }
 0x34e   : > { %5259 = vst [vmem:[#allocation24_spill] sm:$0xff] %v4653_v44 }
 0x350   : > { %v4618_v28 = vpop.f32.mrf.mxu2 }
 0x351   : > { %5247 = vst [vmem:[#allocation12_spill] sm:$0xff] %v4618_v28 }
 0x352   : > { %v4620_v52 = vpop.f32.mrf.mxu3 }
 0x355   : > { %1719 = vmatmul.f32.gmra.mxu2 %v3272_v37  ;;  %v4655_v37 = vpop.f32.mrf.mxu0 }
 0x356   : > { %5260 = vst [vmem:[#allocation25_spill] sm:$0xff] %v4655_v37  ;;  %v3505_v37 = vld [vmem:[%s5229_s2 + $0x10] sm:$0xff] }
 0x357   : > { %1786 = vmatpush.bf16.msra.mxu2 %v3505_v37 }
 0x358   : > { %v4627_v24 = vpop.f32.mrf.mxu2 }
 0x359   : > { %5249 = vst [vmem:[#allocation14_spill] sm:$0xff] %v4627_v24 }
 0x35a   : > { %v1616_v57 = vpop.f32.mrf.mxu3 }
 0x35b   : > { %v4633_v8 = vadd.f32 %v1616_v57, %v1066_v14 }
 0x35d   : > { %1722 = vmatmul.f32.gmra.mxu2 %v3274_v58  ;;  %v4658_v58 = vpop.f32.mrf.mxu0 }
 0x35e   : > { %5261 = vst [vmem:[#allocation26_spill] sm:$0xff] %v4658_v58 }
 0x360   : > { %v4637_v60 = vpop.f32.mrf.mxu2 }
 0x361   : > { %5251 = vst [vmem:[#allocation16_spill] sm:$0xff] %v4637_v60 }
 0x362   : > { %v4639_v5 = vpop.f32.mrf.mxu3 }
 0x363   : > { %5252 = vst [vmem:[#allocation17_spill] sm:$0xff] %v4639_v5 }
 0x368   : > { %v4641_v13 = vpop.f32.mrf.mxu2 }
 0x369   : > { %5253 = vst [vmem:[#allocation18_spill] sm:$0xff] %v4641_v13 }
 0x36a   : > { %v1621_v18 = vpop.f32.mrf.mxu3 }
 0x36b   : > { %v4645_v63 = vadd.f32 %v1621_v18, %v1071_v10  ;;  %v2300_v10 = vpop.f32.mrf.mxu1 }
 0x36d   : > { %5255 = vst [vmem:[#allocation20_spill] sm:$0xff] %v4645_v63 }
 0x370   : > { %v4647_v35 = vpop.f32.mrf.mxu2 }
 0x371   : > { %5256 = vst [vmem:[#allocation21_spill] sm:$0xff] %v4647_v35 }
 0x373   : > { %v2303_v13 = vpop.f32.mrf.mxu1 }
 0x378   : > { %v4651_v43 = vpop.f32.mrf.mxu2 }
 0x379   : > { %5258 = vst [vmem:[#allocation23_spill] sm:$0xff] %v4651_v43  ;;  %v4661_v43 = vpop.f32.mrf.mxu0 }
 0x37a   : > { %5262 = vst [vmem:[#allocation27_spill] sm:$0xff] %v4661_v43 }
 0x37b   : > { %v2306_v24 = vpop.f32.mrf.mxu1 }
 0x380   : > { %v1457_v46 = vpop.f32.mrf.mxu2 }
 0x388   : > { %v1460_v14 = vpop.f32.mrf.mxu2 }
 0x389   : > { %v1493_v57 = vpack.c.bf16 %v1460_v14, %v1457_v46  ;;  %v4666_v46 = vpop.f32.mrf.mxu0 }
 0x38a   : > { %5263 = vst [vmem:[#allocation28_spill] sm:$0xff] %v4666_v46 }
 0x38b   : > { %3262 = vmatmul.msk.bf16.gmra.mxu3 %vm819_vm2, %v1493_v57 }
 0x390   : > { %v1463_v15 = vpop.f32.mrf.mxu2 }
 0x391   : > { %v4669_v58 = vpop.f32.mrf.mxu0 }
 0x392   : > { %5264 = vst [vmem:[#allocation29_spill] sm:$0xff] %v4669_v58 }
 0x398   : > { %v1466_v18 = vpop.f32.mrf.mxu2 }
 0x399   : > { %v1494_v35 = vpack.c.bf16 %v1466_v18, %v1463_v15  ;;  %v1743_v43 = vpop.f32.mrf.mxu0 }
 0x39b   : > { %3263 = vmatmul.msk.bf16.gmra.mxu3 %vm819_vm2, %v1494_v35  ;;  %v2326_v35 = vpop.f32.mrf.mxu1 }
 0x39c   : > { %v2327_v37 = vadd.f32 %v2326_v35, %v2294_v42 }
 0x3a0   : > { %v1469_v60 = vpop.f32.mrf.mxu2 }
 0x3a1   : > { %v1746_v41 = vpop.f32.mrf.mxu0 }
 0x3a3   : > { %v2329_v28 = vpop.f32.mrf.mxu1 }
 0x3a4   : > { %v2330_v34 = vadd.f32 %v2329_v28, %v2297_v53 }
 0x3a8   : > { %v1472_v14 = vpop.f32.mrf.mxu2 }
 0x3a9   : > { %v1495_v57 = vpack.c.bf16 %v1472_v14, %v1469_v60  ;;  %v2341_v60 = vpack.c.bf16 %v2330_v34, %v2327_v37  ;;  %v1749_v58 = vpop.f32.mrf.mxu0 }
 0x3ab   : > { %3264 = vmatmul.msk.bf16.gmra.mxu3 %vm819_vm2, %v1495_v57  ;;  %v2332_v46 = vpop.f32.mrf.mxu1 }
 0x3b0   : > { %v1475_v15 = vpop.f32.mrf.mxu2 }
 0x3b1   : > { %v1752_v22 = vpop.f32.mrf.mxu0 }
 0x3b8   : > { %v1478_v18 = vpop.f32.mrf.mxu2 }
 0x3b9   : > { %v1496_v44 = vpack.c.bf16 %v1478_v18, %v1475_v15  ;;  %v2335_v15 = vpop.f32.mrf.mxu1  ;;  %v2333_v18 = vadd.f32 %v2332_v46, %v2300_v10 }
 0x3bb   : > { %3265 = vmatmul.msk.bf16.gmra.mxu3 %vm819_vm2, %v1496_v44  ;;  %v2336_v44 = vadd.f32 %v2335_v15, %v2303_v13  ;;  %v4678_v13 = vpop.f32.mrf.mxu3 }
 0x3bc   : > { %5265 = vst [vmem:[#allocation30_spill] sm:$0xff] %v4678_v13 }
 0x3bd   : > { %v2342_v26 = vpack.c.bf16 %v2336_v44, %v2333_v18 }
 0x3c0   : > { %v1711_v9 = vpop.f32.mrf.mxu2 }
 0x3c1   : > { %v1744_v14 = vadd.f32 %v1743_v43, %v1711_v9 }
 0x3c8   : > { %v1714_v40 = vpop.f32.mrf.mxu2 }
 0x3c9   : > { %v1747_v17 = vadd.f32 %v1746_v41, %v1714_v40  ;;  %v2338_v40 = vpop.f32.mrf.mxu1 }
 0x3ca   : > { %v2339_v34 = vadd.f32 %v2338_v40, %v2306_v24  ;;  %v3567_v40 = vld [vmem:[%s5230_s3 + $0x3] ss:$0 sm:$0xff] }
 0x3cb   : > { %v1758_v57 = vpack.c.bf16 %v1747_v17, %v1744_v14  ;;  %3395 = vmatmul.msk.bf16.vlgmr.msra.gmra.mxu3 %vm494_vm0, %v2341_v60  ;;  %v1755_v17 = vpop.f32.mrf.mxu0 }
 0x3cc   : > { %v2343_v43 = vpack.c.bf16 %v2339_v34, %v2339_v34  ;;  %v3569_v34 = vld [vmem:[%s5230_s3 + $0x2] ss:$0 sm:$0xff] }
 0x3cd   : > { %3282 = vmatmul.msk.bf16.vlgmr.msra.gmra.mxu2 %vm494_vm0, %v1758_v57 }
 0x3d0   : > { %v1717_v11 = vpop.f32.mrf.mxu2 }
 0x3d1   : > { %v1750_v42 = vadd.f32 %v1749_v58, %v1717_v11  ;;  %v4680_v11 = vpop.f32.mrf.mxu3 }
 0x3d2   : > { %5266 = vst [vmem:[#allocation31_spill] sm:$0xff] %v4680_v11 }
 0x3d8   : > { %v1720_v32 = vpop.f32.mrf.mxu2 }
 0x3d9   : > { %v1753_v28 = vadd.f32 %v1752_v22, %v1720_v32  ;;  %v4682_v32 = vpop.f32.mrf.mxu3 }
 0x3da   : > { %5267 = vst [vmem:[#allocation32_spill] sm:$0xff] %v4682_v32 }
 0x3db   : > { %v1759_v53 = vpack.c.bf16 %v1753_v28, %v1750_v42  ;;  %3396 = vmatmul.msk.bf16.gmra.mxu3 %vm494_vm0, %v2342_v26 }
 0x3dd   : > { %3283 = vmatmul.msk.bf16.gmra.mxu2 %vm494_vm0, %v1759_v53 }
 0x3e0   : > { %v1723_v41 = vpop.f32.mrf.mxu2 }
 0x3e1   : > { %v1756_v9 = vadd.f32 %v1755_v17, %v1723_v41  ;;  %v3568_v17 = vld [vmem:[%s5231_s4 + $0x3] ss:$0 sm:$0xff] }
 0x3e3   : > { %v1760_v35 = vpack.c.bf16 %v1756_v9, %v1756_v9 }
 0x3eb   : > { %3397 = vmatmul.msk.bf16.gmra.mxu3 %vm494_vm0, %v2343_v43 }
 0x3ed   : > { %3284 = vmatmul.msk.bf16.gmra.mxu2 %vm494_vm0, %v1760_v35 }
 0x40e   : > { %v4684_v26 = vpop.f32.mrf.mxu3 }
 0x40f   : > { %5268 = vst [vmem:[#allocation33_spill] sm:$0xff] %v4684_v26 }
 0x416   : > { %v4686_v22 = vpop.f32.mrf.mxu3 }
 0x417   : > { %5269 = vst [vmem:[#allocation34_spill] sm:$0xff] %v4686_v22 }
 0x41e   : > { %v4688_v58 = vpop.f32.mrf.mxu3 }
 0x41f   : > { %5270 = vst [vmem:[#allocation35_spill] sm:$0xff] %v4688_v58 }
 0x426   : > { %v4690_v24 = vpop.f32.mrf.mxu3 }
 0x427   : > { %5271 = vst [vmem:[#allocation36_spill] sm:$0xff] %v4690_v24 }
 0x42e   : > { %v4692_v10 = vpop.f32.mrf.mxu3 }
 0x42f   : > { %5272 = vst [vmem:[#allocation37_spill] sm:$0xff] %v4692_v10 }
 0x436   : > { %v4694_v46 = vpop.f32.mrf.mxu3 }
 0x437   : > { %5273 = vst [vmem:[#allocation38_spill] sm:$0xff] %v4694_v46 }
 0x43e   : > { %v4696_v37 = vpop.f32.mrf.mxu3 }
 0x43f   : > { %5274 = vst [vmem:[#allocation39_spill] sm:$0xff] %v4696_v37 }
 0x446   : > { %v4698_v60 = vpop.f32.mrf.mxu3 }
 0x447   : > { %5275 = vst [vmem:[#allocation40_spill] sm:$0xff] %v4698_v60  ;;  %v3570_v60 = vld [vmem:[%s5231_s4 + $0x2] ss:$0 sm:$0xff] }
 0x44e   : > { %v2371_v14 = vpop.f32.mrf.mxu3 }
 0x44f   : > { %v2390_v11 = vmul.f32 %v3567_v40, %v2371_v14  ;;  %v3407_v14 = vld [vmem:[%s5232_s5 + $0x338] sm:$0xff] }
 0x450   : > { %v1788_v57 = vpop.f32.mrf.mxu2 }
 0x456   : > { %v2373_v15 = vpop.f32.mrf.mxu3 }
 0x457   : > { %v2391_v58 = vmul.f32 %v3567_v40, %v2373_v15  ;;  %v3408_v15 = vld [vmem:[%s5232_s5 + $0x340] sm:$0xff] }
 0x458   : > { %v1790_v18 = vpop.f32.mrf.mxu2 }
 0x459   : > { %v1808_v13 = vmul.f32 %v3569_v34, %v1790_v18  ;;  %v2401_v5 = vadd.f32 %v3568_v17, %v2391_v58  ;;  %v3405_v58 = vld [vmem:[%s5232_s5 + $0x328] sm:$0xff]  ;;  %v3295_v18 = vld [vmem:[%s5232_s5 + $0x240] sm:$0xff] }
 0x45e   : > { %v2376_v44 = vpop.f32.mrf.mxu3 }
 0x45f   : > { %v2392_v37 = vmul.f32 %v3567_v40, %v2376_v44 }
 0x460   : > { %v1793_v42 = vpop.f32.mrf.mxu2 }
 0x461   : > { %v1809_v22 = vmul.f32 %v3569_v34, %v1793_v42  ;;  %v2402_v56 = vadd.f32 %v3568_v17, %v2392_v37  ;;  %v3406_v37 = vld [vmem:[%s5232_s5 + $0x330] sm:$0xff]  ;;  %v3409_v42 = vld [vmem:[%s5232_s5 + $0x348] sm:$0xff] }
 0x463   : > { %v1819_v4 = vadd.f32 %v3570_v60, %v1809_v22  ;;  %v3291_v22 = vld [vmem:[%s5232_s5 + $0x220] sm:$0xff] }
 0x466   : > { %v2378_v28 = vpop.f32.mrf.mxu3 }
 0x467   : > { %v2393_v9 = vmul.f32 %v3567_v40, %v2378_v28 }
 0x468   : > { %v1795_v53 = vpop.f32.mrf.mxu2 }
 0x469   : > { %v1810_v46 = vmul.f32 %v3569_v34, %v1795_v53  ;;  %v2403_v26 = vadd.f32 %v3568_v17, %v2393_v9  ;;  %v2400_v53 = vadd.f32 %v3568_v17, %v2390_v11  ;;  %v3290_v11 = vld [vmem:[%s5232_s5 + $0x218] sm:$0xff]  ;;  %v3507_v9 = vld [vmem:[%s5233_s6 + $0x28] sm:$0xff] }
 0x46a   : > { %2151 = vmatpush.bf16.msrb.mxu2 %v3507_v9 }
 0x46b   : > { %v1820_v63 = vadd.f32 %v3570_v60, %v1810_v46  ;;  %v3292_v46 = vld [vmem:[%s5232_s5 + $0x228] sm:$0xff] }
 0x46e   : > { %v2381_v41 = vpop.f32.mrf.mxu3 }
 0x46f   : > { %v2394_v43 = vmul.f32 %v3567_v40, %v2381_v41  ;;  %v1807_v41 = vmul.f32 %v3569_v34, %v1788_v57  ;;  %v3294_v57 = vld [vmem:[%s5232_s5 + $0x238] sm:$0xff]  ;;  %v3296_v40 = vld [vmem:[%s5232_s5 + $0x248] sm:$0xff] }
 0x470   : > { %v1798_v35 = vpop.f32.mrf.mxu2 }
 0x471   : > { %v2404_v10 = vadd.f32 %v3568_v17, %v2394_v43  ;;  %v1811_v24 = vmul.f32 %v3569_v34, %v1798_v35  ;;  %v1818_v43 = vadd.f32 %v3570_v60, %v1808_v13  ;;  %v3403_v13 = vld [vmem:[%s5232_s5 + $0x318] sm:$0xff]  ;;  %v3410_v17 = vld [vmem:[%s5232_s5 + $0x350] sm:$0xff] }
 0x472   : > { %v3297_v34 = vld [vmem:[%s5232_s5 + $0x250] sm:$0xff]  ;;  %v3411_v35 = vld [vmem:[%s5232_s5 + $0x358] sm:$0xff] }
 0x473   : > { %v1821_v32 = vadd.f32 %v3570_v60, %v1811_v24  ;;  %2545 = vmatpush.msrb.mxu1 %v2404_v10  ;;  %v3400_v24 = vld [vmem:[%s5232_s5 + $0x300] sm:$0xff]  ;;  %v1817_v10 = vadd.f32 %v3570_v60, %v1807_v41  ;;  %v3293_v60 = vld [vmem:[%s5232_s5 + $0x230] sm:$0xff]  ;;  %v3510_v41 = vld [vmem:[%s5233_s6 + $0x38] sm:$0xff] }
 0x474   : > { %2734 = vmatpush.bf16.msrb.mxu3 %v3510_v41 }
 0x475   : > { %1962 = vmatpush.msra.mxu0 %v1821_v32  ;;  %2546 = vmatpush.msrb.mxu1 %v2403_v26  ;;  %v3287_v32 = vld [vmem:[%s5232_s5 + $0x200] sm:$0xff] }
 0x476   : > { %v2383_v28 = vpop.f32.mrf.mxu3  ;;  %v3404_v26 = vld [vmem:[%s5232_s5 + $0x320] sm:$0xff] }
 0x477   : > { %1963 = vmatpush.msra.mxu0 %v1820_v63  ;;  %2547 = vmatpush.msrb.mxu1 %v2402_v56  ;;  %v3401_v56 = vld [vmem:[%s5232_s5 + $0x308] sm:$0xff]  ;;  %v3289_v63 = vld [vmem:[%s5232_s5 + $0x210] sm:$0xff]  ;;  %v3298_v28 = vld [vmem:[%s5232_s5 + $0x258] sm:$0xff] }
 0x478   : > { %v1800_v44 = vpop.f32.mrf.mxu2 }
 0x479   : > { %1964 = vmatpush.msra.mxu0 %v1819_v4  ;;  %2548 = vmatpush.msrb.mxu1 %v2401_v5  ;;  %v3288_v4 = vld [vmem:[%s5232_s5 + $0x208] sm:$0xff]  ;;  %v3402_v5 = vld [vmem:[%s5232_s5 + $0x310] sm:$0xff]  ;;  %v3412_v44 = vld [vmem:[%s5232_s5 + $0x360] sm:$0xff] }
 0x47b   : > { %1965 = vmatpush.msra.mxu0 %v1818_v43  ;;  %2549 = vmatpush.msrb.mxu1 %v2400_v53  ;;  %v3299_v53 = vld [vmem:[%s5232_s5 + $0x260] sm:$0xff]  ;;  %v3509_v43 = vld [vmem:[%s5233_s6 + $0x30] sm:$0xff] }
 0x47c   : > { %3432 = vmatmul.msk.f32.vlgmr.msrb.gmra.mxu1 %vm577_vm1, %v3400_v24  ;;  %v3413_v24 = vld [vmem:[%s5232_s5 + $0x368] sm:$0xff]  ;;  %2735 = vmatpush.bf16.msrb.mxu3 %v3509_v43 }
 0x47d   : > { %1966 = vmatpush.msra.mxu0 %v1817_v10  ;;  %v3506_v10 = vld [vmem:[%s5233_s6 + $0x20] sm:$0xff] }
 0x47e   : > { %3319 = vmatmul.msk.f32.vlgmr.msra.gmra.mxu0 %vm577_vm1, %v3287_v32  ;;  %v3300_v32 = vld [vmem:[%s5232_s5 + $0x268] sm:$0xff]  ;;  %2152 = vmatpush.bf16.msrb.mxu2 %v3506_v10 }
 0x484   : > { %3433 = vmatmul.msk.f32.gmra.mxu1 %vm577_vm1, %v3401_v56  ;;  %v3414_v56 = vld [vmem:[%s5232_s5 + $0x370] sm:$0xff] }
 0x486   : > { %3320 = vmatmul.msk.f32.gmra.mxu0 %vm577_vm1, %v3288_v4  ;;  %v3301_v4 = vld [vmem:[%s5232_s5 + $0x270] sm:$0xff] }
 0x48c   : > { %3434 = vmatmul.msk.f32.gmra.mxu1 %vm577_vm1, %v3402_v5  ;;  %v3415_v5 = vld [vmem:[%s5232_s5 + $0x378] sm:$0xff] }
 0x48e   : > { %3321 = vmatmul.msk.f32.gmra.mxu0 %vm577_vm1, %v3289_v63  ;;  %v3302_v63 = vld [vmem:[%s5232_s5 + $0x278] sm:$0xff] }
 0x494   : > { %3435 = vmatmul.msk.f32.gmra.mxu1 %vm577_vm1, %v3403_v13 }
 0x496   : > { %3322 = vmatmul.msk.f32.gmra.mxu0 %vm577_vm1, %v3290_v11  ;;  %v3416_v11 = vld [vmem:[%s5232_s5 + $0x380] sm:$0xff] }
 0x49c   : > { %3436 = vmatmul.msk.f32.gmra.mxu1 %vm577_vm1, %v3404_v26 }
 0x49e   : > { %3323 = vmatmul.msk.f32.gmra.mxu0 %vm577_vm1, %v3291_v22  ;;  %v3303_v22 = vld [vmem:[%s5232_s5 + $0x280] sm:$0xff] }
 0x4a4   : > { %3437 = vmatmul.msk.f32.gmra.mxu1 %vm577_vm1, %v3405_v58 }
 0x4a6   : > { %3324 = vmatmul.msk.f32.gmra.mxu0 %vm577_vm1, %v3292_v46  ;;  %v3417_v46 = vld [vmem:[%s5232_s5 + $0x388] sm:$0xff] }
 0x4ac   : > { %3438 = vmatmul.msk.f32.gmra.mxu1 %vm577_vm1, %v3406_v37 }
 0x4ae   : > { %3325 = vmatmul.msk.f32.gmra.mxu0 %vm577_vm1, %v3293_v60 }
 0x4b4   : > { %3439 = vmatmul.msk.f32.gmra.mxu1 %vm577_vm1, %v3407_v14  ;;  %v3304_v14 = vld [vmem:[%s5232_s5 + $0x288] sm:$0xff] }
 0x4b6   : > { %3326 = vmatmul.msk.f32.gmra.mxu0 %vm577_vm1, %v3294_v57 }
 0x4bc   : > { %3440 = vmatmul.msk.f32.gmra.mxu1 %vm577_vm1, %v3408_v15 }
 0x4be   : > { %3327 = vmatmul.msk.f32.gmra.mxu0 %vm577_vm1, %v3295_v18  ;;  %v3418_v18 = vld [vmem:[%s5232_s5 + $0x390] sm:$0xff] }
 0x4c4   : > { %3441 = vmatmul.msk.f32.gmra.mxu1 %vm577_vm1, %v3409_v42 }
 0x4c6   : > { %3328 = vmatmul.msk.f32.gmra.mxu0 %vm577_vm1, %v3296_v40  ;;  %v3305_v40 = vld [vmem:[%s5232_s5 + $0x290] sm:$0xff] }
 0x4cc   : > { %3442 = vmatmul.msk.f32.gmra.mxu1 %vm577_vm1, %v3410_v17 }
 0x4ce   : > { %3329 = vmatmul.msk.f32.gmra.mxu0 %vm577_vm1, %v3297_v34  ;;  %v3419_v34 = vld [vmem:[%s5232_s5 + $0x398] sm:$0xff] }
 0x4d4   : > { %3443 = vmatmul.msk.f32.gmra.mxu1 %vm577_vm1, %v3411_v35 }
 0x4d6   : > { %3330 = vmatmul.msk.f32.gmra.mxu0 %vm577_vm1, %v3298_v28  ;;  %v3306_v28 = vld [vmem:[%s5232_s5 + $0x298] sm:$0xff] }
 0x4dc   : > { %3444 = vmatmul.msk.f32.gmra.mxu1 %vm577_vm1, %v3412_v44 }
 0x4de   : > { %3331 = vmatmul.msk.f32.gmra.mxu0 %vm577_vm1, %v3299_v53  ;;  %v3420_v53 = vld [vmem:[%s5232_s5 + $0x3a0] sm:$0xff] }
 0x4e4   : > { %3445 = vmatmul.msk.f32.gmra.mxu1 %vm577_vm1, %v3413_v24  ;;  %v3307_v24 = vld [vmem:[%s5232_s5 + $0x2a0] sm:$0xff] }
 0x4e6   : > { %3332 = vmatmul.msk.f32.gmra.mxu0 %vm577_vm1, %v3300_v32  ;;  %v3421_v32 = vld [vmem:[%s5232_s5 + $0x3a8] sm:$0xff] }
 0x4ec   : > { %3446 = vmatmul.msk.f32.gmra.mxu1 %vm577_vm1, %v3414_v56 }
 0x4ee   : > { %3333 = vmatmul.msk.f32.gmra.mxu0 %vm577_vm1, %v3301_v4 }
 0x4f4   : > { %3447 = vmatmul.msk.f32.gmra.mxu1 %vm577_vm1, %v3415_v5  ;;  %v3308_v5 = vld [vmem:[%s5232_s5 + $0x2a8] sm:$0xff] }
 0x4f6   : > { %3334 = vmatmul.msk.f32.gmra.mxu0 %vm577_vm1, %v3302_v63 }
 0x4f9   : > { %v2551_v13 = vpop.f32.mrf.mxu1 }
 0x4fb   : > { %v1968_v26 = vpop.f32.mrf.mxu0 }
 0x4fc   : > { %3448 = vmatmul.msk.f32.gmra.mxu1 %vm577_vm1, %v3416_v11  ;;  %v3422_v11 = vld [vmem:[%s5232_s5 + $0x3b0] sm:$0xff] }
 0x4fe   : > { %3335 = vmatmul.msk.f32.gmra.mxu0 %vm577_vm1, %v3303_v22  ;;  %v3309_v22 = vld [vmem:[%s5232_s5 + $0x2b0] sm:$0xff] }
 0x501   : > { %v2554_v58 = vpop.f32.mrf.mxu1 }
 0x502   : > { %v2647_v37 = vpack.c.bf16 %v2554_v58, %v2551_v13 }
 0x503   : > { %v1971_v60 = vpop.f32.mrf.mxu0 }
 0x504   : > { %v2064_v57 = vpack.c.bf16 %v1971_v60, %v1968_v26  ;;  %3449 = vmatmul.msk.f32.gmra.mxu1 %vm577_vm1, %v3417_v46  ;;  %3476 = vmatmul.msk.bf16.vlgmr.msrb.gmra.mxu3 %vm819_vm2, %v2647_v37  ;;  %v3423_v46 = vld [vmem:[%s5232_s5 + $0x3b8] sm:$0xff] }
 0x506   : > { %3336 = vmatmul.msk.f32.gmra.mxu0 %vm577_vm1, %v3304_v14  ;;  %3363 = vmatmul.msk.bf16.vlgmr.msrb.gmra.mxu2 %vm819_vm2, %v2064_v57  ;;  %v3310_v14 = vld [vmem:[%s5232_s5 + $0x2b8] sm:$0xff] }
 0x509   : > { %v2557_v15 = vpop.f32.mrf.mxu1 }
 0x50b   : > { %v1974_v42 = vpop.f32.mrf.mxu0 }
 0x50c   : > { %3450 = vmatmul.msk.f32.gmra.mxu1 %vm577_vm1, %v3418_v18  ;;  %v3424_v18 = vld [vmem:[%s5232_s5 + $0x3c0] sm:$0xff] }
 0x50e   : > { %3337 = vmatmul.msk.f32.gmra.mxu0 %vm577_vm1, %v3305_v40  ;;  %v3311_v40 = vld [vmem:[%s5232_s5 + $0x2c0] sm:$0xff] }
 0x511   : > { %v2560_v17 = vpop.f32.mrf.mxu1 }
 0x512   : > { %v2648_v9 = vpack.c.bf16 %v2560_v17, %v2557_v15 }
 0x513   : > { %v1977_v35 = vpop.f32.mrf.mxu0 }
 0x514   : > { %v2065_v41 = vpack.c.bf16 %v1977_v35, %v1974_v42  ;;  %3451 = vmatmul.msk.f32.gmra.mxu1 %vm577_vm1, %v3419_v34  ;;  %3477 = vmatmul.msk.bf16.gmra.mxu3 %vm819_vm2, %v2648_v9  ;;  %v3425_v34 = vld [vmem:[%s5232_s5 + $0x3c8] sm:$0xff] }
 0x516   : > { %3338 = vmatmul.msk.f32.gmra.mxu0 %vm577_vm1, %v3306_v28  ;;  %3364 = vmatmul.msk.bf16.gmra.mxu2 %vm819_vm2, %v2065_v41  ;;  %v3312_v28 = vld [vmem:[%s5232_s5 + $0x2c8] sm:$0xff] }
 0x519   : > { %v2563_v44 = vpop.f32.mrf.mxu1 }
 0x51b   : > { %v1980_v43 = vpop.f32.mrf.mxu0 }
 0x51c   : > { %3452 = vmatmul.msk.f32.gmra.mxu1 %vm577_vm1, %v3420_v53  ;;  %v3426_v53 = vld [vmem:[%s5232_s5 + $0x3d0] sm:$0xff] }
 0x51e   : > { %3339 = vmatmul.msk.f32.gmra.mxu0 %vm577_vm1, %v3307_v24  ;;  %v3313_v24 = vld [vmem:[%s5232_s5 + $0x2d0] sm:$0xff] }
 0x521   : > { %v2566_v10 = vpop.f32.mrf.mxu1 }
 0x522   : > { %v2649_v56 = vpack.c.bf16 %v2566_v10, %v2563_v44 }
 0x523   : > { %v1983_v4 = vpop.f32.mrf.mxu0 }
 0x524   : > { %v2066_v63 = vpack.c.bf16 %v1983_v4, %v1980_v43  ;;  %3453 = vmatmul.msk.f32.gmra.mxu1 %vm577_vm1, %v3421_v32  ;;  %3478 = vmatmul.msk.bf16.gmra.mxu3 %vm819_vm2, %v2649_v56  ;;  %v3427_v32 = vld [vmem:[%s5232_s5 + $0x3d8] sm:$0xff] }
 0x526   : > { %3340 = vmatmul.msk.f32.gmra.mxu0 %vm577_vm1, %v3308_v5  ;;  %3365 = vmatmul.msk.bf16.gmra.mxu2 %vm819_vm2, %v2066_v63  ;;  %v3314_v5 = vld [vmem:[%s5232_s5 + $0x2d8] sm:$0xff] }
 0x529   : > { %v2569_v13 = vpop.f32.mrf.mxu1 }
 0x52b   : > { %v1986_v26 = vpop.f32.mrf.mxu0 }
 0x52c   : > { %3454 = vmatmul.msk.f32.gmra.mxu1 %vm577_vm1, %v3422_v11  ;;  %v3428_v11 = vld [vmem:[%s5232_s5 + $0x3e0] sm:$0xff] }
 0x52e   : > { %3341 = vmatmul.msk.f32.gmra.mxu0 %vm577_vm1, %v3309_v22  ;;  %v3315_v22 = vld [vmem:[%s5232_s5 + $0x2e0] sm:$0xff] }
 0x531   : > { %v2572_v58 = vpop.f32.mrf.mxu1 }
 0x532   : > { %v2650_v37 = vpack.c.bf16 %v2572_v58, %v2569_v13 }
 0x533   : > { %v1989_v60 = vpop.f32.mrf.mxu0 }
 0x534   : > { %v2067_v57 = vpack.c.bf16 %v1989_v60, %v1986_v26  ;;  %3455 = vmatmul.msk.f32.gmra.mxu1 %vm577_vm1, %v3423_v46  ;;  %3479 = vmatmul.msk.bf16.gmra.mxu3 %vm819_vm2, %v2650_v37  ;;  %v3429_v46 = vld [vmem:[%s5232_s5 + $0x3e8] sm:$0xff] }
 0x536   : > { %3342 = vmatmul.msk.f32.gmra.mxu0 %vm577_vm1, %v3310_v14  ;;  %3366 = vmatmul.msk.bf16.gmra.mxu2 %vm819_vm2, %v2067_v57  ;;  %v3316_v14 = vld [vmem:[%s5232_s5 + $0x2e8] sm:$0xff] }
 0x539   : > { %v2575_v15 = vpop.f32.mrf.mxu1 }
 0x53b   : > { %v1992_v42 = vpop.f32.mrf.mxu0 }
 0x53c   : > { %3456 = vmatmul.msk.f32.gmra.mxu1 %vm577_vm1, %v3424_v18  ;;  %v3430_v18 = vld [vmem:[%s5232_s5 + $0x3f0] sm:$0xff] }
 0x53e   : > { %3343 = vmatmul.msk.f32.gmra.mxu0 %vm577_vm1, %v3311_v40  ;;  %v3317_v40 = vld [vmem:[%s5232_s5 + $0x2f0] sm:$0xff] }
 0x541   : > { %v2578_v17 = vpop.f32.mrf.mxu1 }
 0x542   : > { %v2651_v9 = vpack.c.bf16 %v2578_v17, %v2575_v15 }
 0x543   : > { %v1995_v35 = vpop.f32.mrf.mxu0 }
 0x544   : > { %v2068_v41 = vpack.c.bf16 %v1995_v35, %v1992_v42  ;;  %3457 = vmatmul.msk.f32.gmra.mxu1 %vm577_vm1, %v3425_v34  ;;  %3480 = vmatmul.msk.bf16.gmra.mxu3 %vm819_vm2, %v2651_v9  ;;  %v3431_v34 = vld [vmem:[%s5232_s5 + $0x3f8] sm:$0xff] }
 0x546   : > { %3344 = vmatmul.msk.f32.gmra.mxu0 %vm577_vm1, %v3312_v28  ;;  %3367 = vmatmul.msk.bf16.gmra.mxu2 %vm819_vm2, %v2068_v41  ;;  %v3318_v28 = vld [vmem:[%s5232_s5 + $0x2f8] sm:$0xff] }
 0x549   : > { %v2581_v44 = vpop.f32.mrf.mxu1 }
 0x54b   : > { %v1998_v43 = vpop.f32.mrf.mxu0 }
 0x54c   : > { %3458 = vmatmul.msk.f32.gmra.mxu1 %vm577_vm1, %v3426_v53 }
 0x54e   : > { %3345 = vmatmul.msk.f32.gmra.mxu0 %vm577_vm1, %v3313_v24 }
 0x551   : > { %v2584_v10 = vpop.f32.mrf.mxu1 }
 0x552   : > { %v2652_v56 = vpack.c.bf16 %v2584_v10, %v2581_v44 }
 0x553   : > { %v2001_v4 = vpop.f32.mrf.mxu0 }
 0x554   : > { %v2069_v63 = vpack.c.bf16 %v2001_v4, %v1998_v43  ;;  %3459 = vmatmul.msk.f32.gmra.mxu1 %vm577_vm1, %v3427_v32  ;;  %3481 = vmatmul.msk.bf16.gmra.mxu3 %vm819_vm2, %v2652_v56 }
 0x556   : > { %3346 = vmatmul.msk.f32.gmra.mxu0 %vm577_vm1, %v3314_v5  ;;  %3368 = vmatmul.msk.bf16.gmra.mxu2 %vm819_vm2, %v2069_v63 }
 0x559   : > { %v2587_v13 = vpop.f32.mrf.mxu1 }
 0x55b   : > { %v2004_v26 = vpop.f32.mrf.mxu0 }
 0x55c   : > { %3460 = vmatmul.msk.f32.gmra.mxu1 %vm577_vm1, %v3428_v11 }
 0x55e   : > { %3347 = vmatmul.msk.f32.gmra.mxu0 %vm577_vm1, %v3315_v22  ;;  %v5008_v22 = vld [vmem:[%s5236_s9] ss:$0 sm:$0xff] }
 0x561   : > { %v2590_v58 = vpop.f32.mrf.mxu1 }
 0x562   : > { %v2653_v37 = vpack.c.bf16 %v2590_v58, %v2587_v13  ;;  %v5002_v13 = vld [vmem:[%s5235_s8] ss:$0 sm:$0xff] }
 0x563   : > { %v2007_v60 = vpop.f32.mrf.mxu0 }
 0x564   : > { %v2070_v57 = vpack.c.bf16 %v2007_v60, %v2004_v26  ;;  %3461 = vmatmul.msk.f32.gmra.mxu1 %vm577_vm1, %v3429_v46  ;;  %3482 = vmatmul.msk.bf16.gmra.mxu3 %vm819_vm2, %v2653_v37 }
 0x566   : > { %3348 = vmatmul.msk.f32.gmra.mxu0 %vm577_vm1, %v3316_v14  ;;  %3369 = vmatmul.msk.bf16.gmra.mxu2 %vm819_vm2, %v2070_v57 }
 0x569   : > { %v2593_v15 = vpop.f32.mrf.mxu1 }
 0x56b   : > { %v2010_v42 = vpop.f32.mrf.mxu0 }
 0x56c   : > { %3462 = vmatmul.msk.f32.gmra.mxu1 %vm577_vm1, %v3430_v18 }
 0x56e   : > { %3349 = vmatmul.msk.f32.gmra.mxu0 %vm577_vm1, %v3317_v40 }
 0x571   : > { %v2596_v17 = vpop.f32.mrf.mxu1 }
 0x572   : > { %v2654_v9 = vpack.c.bf16 %v2596_v17, %v2593_v15 }
 0x573   : > { %v2013_v35 = vpop.f32.mrf.mxu0 }
 0x574   : > { %v2071_v41 = vpack.c.bf16 %v2013_v35, %v2010_v42  ;;  %3463 = vmatmul.msk.f32.gmra.mxu1 %vm577_vm1, %v3431_v34  ;;  %3483 = vmatmul.msk.bf16.gmra.mxu3 %vm819_vm2, %v2654_v9 }
 0x576   : > { %3350 = vmatmul.msk.f32.gmra.mxu0 %vm577_vm1, %v3318_v28  ;;  %3370 = vmatmul.msk.bf16.gmra.mxu2 %vm819_vm2, %v2071_v41 }
 0x579   : > { %v2599_v44 = vpop.f32.mrf.mxu1 }
 0x57b   : > { %v2016_v53 = vpop.f32.mrf.mxu0 }
 0x581   : > { %v2602_v43 = vpop.f32.mrf.mxu1 }
 0x582   : > { %v2655_v24 = vpack.c.bf16 %v2602_v43, %v2599_v44 }
 0x583   : > { %v2019_v10 = vpop.f32.mrf.mxu0 }
 0x584   : > { %v2072_v32 = vpack.c.bf16 %v2019_v10, %v2016_v53  ;;  %3484 = vmatmul.msk.bf16.gmra.mxu3 %vm819_vm2, %v2655_v24  ;;  %v1654_v10 = vadd.f32 %v4465_v61, %v4391_v59 }
 0x586   : > { %3371 = vmatmul.msk.bf16.gmra.mxu2 %vm819_vm2, %v2072_v32 }
 0x587   : > { %v2737_v56 = vpop.f32.mrf.mxu3 }
 0x589   : > { %v2154_v4 = vpop.f32.mrf.mxu2  ;;  %v2605_v5 = vpop.f32.mrf.mxu1 }
 0x58a   : > { %v2234_v63 = vadd.f32 %v2154_v4, %v4431_v20  ;;  %v1652_v20 = vadd.f32 %v4444_v27, %v4379_v50 }
 0x58b   : > { %v2022_v11 = vpop.f32.mrf.mxu0 }
 0x58c   : > { %v2817_v26 = vadd.f32 %v2737_v56, %v2234_v63 }
 0x58e   : > { %v2853_v58 = vmul.f32 %v5002_v13, %v2817_v26 }
 0x58f   : > { %v2739_v46 = vpop.f32.mrf.mxu3 }
 0x590   : > { %v2889_v37 = vadd.f32 %v5008_v22, %v2853_v58 }
 0x591   : > { %v2156_v60 = vpop.f32.mrf.mxu2  ;;  %v2608_v14 = vpop.f32.mrf.mxu1 }
 0x592   : > { %v2921_v57 = vmax.f32 %v2889_v37, 0.0  ;;  %v2235_v15 = vadd.f32 %v2156_v60, %v1652_v20  ;;  %v2656_v18 = vpack.c.bf16 %v2608_v14, %v2605_v5 }
 0x593   : > { %v2025_v42 = vpop.f32.mrf.mxu0 }
 0x594   : > { %2953 = vst [vmem:[%s5016_s21] sm:$0xff] %v2921_v57  ;;  %v2073_v40 = vpack.c.bf16 %v2025_v42, %v2022_v11  ;;  %v2818_v17 = vadd.f32 %v2739_v46, %v2235_v15  ;;  %3485 = vmatmul.msk.bf16.gmra.mxu3 %vm819_vm2, %v2656_v18 }
 0x596   : > { %v2854_v34 = vmul.f32 %v5002_v13, %v2818_v17  ;;  %3372 = vmatmul.msk.bf16.gmra.mxu2 %vm819_vm2, %v2073_v40  ;;  %v1656_v40 = vadd.f32 %v4485_v6, %v4403_v7 }
 0x597   : > { %v2742_v50 = vpop.f32.mrf.mxu3 }
 0x598   : > { %v2890_v27 = vadd.f32 %v5008_v22, %v2854_v34 }
 0x599   : > { %v2159_v9 = vpop.f32.mrf.mxu2  ;;  %v2611_v35 = vpop.f32.mrf.mxu1 }
 0x59a   : > { %v2922_v28 = vmax.f32 %v2890_v27, 0.0  ;;  %v2236_v41 = vadd.f32 %v2159_v9, %v4457_v55 }
 0x59b   : > { %v2028_v44 = vpop.f32.mrf.mxu0 }
 0x59c   : > { %2954 = vst [vmem:[%s5016_s21 + $0x8] sm:$0xff] %v2922_v28  ;;  %v2819_v53 = vadd.f32 %v2742_v50, %v2236_v41 }
 0x59e   : > { %v2855_v43 = vmul.f32 %v5002_v13, %v2819_v53 }
 0x59f   : > { %v2744_v24 = vpop.f32.mrf.mxu3 }
 0x5a0   : > { %v2891_v32 = vadd.f32 %v5008_v22, %v2855_v43 }
 0x5a1   : > { %v2161_v56 = vpop.f32.mrf.mxu2  ;;  %v2614_v4 = vpop.f32.mrf.mxu1 }
 0x5a2   : > { %v2923_v5 = vmax.f32 %v2891_v32, 0.0  ;;  %v2237_v63 = vadd.f32 %v2161_v56, %v1654_v10  ;;  %v2657_v11 = vpack.c.bf16 %v2614_v4, %v2611_v35 }
 0x5a3   : > { %v2031_v26 = vpop.f32.mrf.mxu0 }
 0x5a4   : > { %2955 = vst [vmem:[%s5016_s21 + $0x10] sm:$0xff] %v2923_v5  ;;  %v2074_v55 = vpack.c.bf16 %v2031_v26, %v2028_v44  ;;  %v2820_v58 = vadd.f32 %v2744_v24, %v2237_v63  ;;  %3486 = vmatmul.msk.bf16.gmra.mxu3 %vm819_vm2, %v2657_v11  ;;  %v1658_v63 = vadd.f32 %v4507_v38, %v4415_v39 }
 0x5a6   : > { %v2856_v46 = vmul.f32 %v5002_v13, %v2820_v58  ;;  %3373 = vmatmul.msk.bf16.gmra.mxu2 %vm819_vm2, %v2074_v55 }
 0x5a7   : > { %v2747_v20 = vpop.f32.mrf.mxu3 }
 0x5a8   : > { %v2892_v59 = vadd.f32 %v5008_v22, %v2856_v46 }
 0x5a9   : > { %v2164_v61 = vpop.f32.mrf.mxu2  ;;  %v2617_v37 = vpop.f32.mrf.mxu1 }
 0x5aa   : > { %v2924_v60 = vmax.f32 %v2892_v59, 0.0  ;;  %v2238_v14 = vadd.f32 %v2164_v61, %v4477_v1 }
 0x5ab   : > { %v2034_v57 = vpop.f32.mrf.mxu0 }
 0x5ac   : > { %2956 = vst [vmem:[%s5016_s21 + $0x18] sm:$0xff] %v2924_v60  ;;  %v2821_v15 = vadd.f32 %v2747_v20, %v2238_v14 }
 0x5ae   : > { %v2857_v18 = vmul.f32 %v5002_v13, %v2821_v15 }
 0x5af   : > { %v2749_v42 = vpop.f32.mrf.mxu3 }
 0x5b0   : > { %v2893_v17 = vadd.f32 %v5008_v22, %v2857_v18 }
 0x5b1   : > { %v2166_v34 = vpop.f32.mrf.mxu2  ;;  %v2620_v50 = vpop.f32.mrf.mxu1 }
 0x5b2   : > { %v2925_v27 = vmax.f32 %v2893_v17, 0.0  ;;  %v2239_v9 = vadd.f32 %v2166_v34, %v1656_v40  ;;  %v2658_v35 = vpack.c.bf16 %v2620_v50, %v2617_v37  ;;  %v1043_v40 = vadd.f32 %v4447_v51, %v4425_v47 }
 0x5b3   : > { %v2037_v28 = vpop.f32.mrf.mxu0 }
 0x5b4   : > { %2957 = vst [vmem:[%s5016_s21 + $0x20] sm:$0xff] %v2925_v27  ;;  %v2075_v1 = vpack.c.bf16 %v2037_v28, %v2034_v57  ;;  %v2822_v41 = vadd.f32 %v2749_v42, %v2239_v9  ;;  %3487 = vmatmul.msk.bf16.gmra.mxu3 %vm819_vm2, %v2658_v35  ;;  %v1660_v50 = vadd.f32 %v4533_v25, %v1043_v40 }
 0x5b6   : > { %v2858_v44 = vmul.f32 %v5002_v13, %v2822_v41  ;;  %3374 = vmatmul.msk.bf16.gmra.mxu2 %vm819_vm2, %v2075_v1 }
 0x5b7   : > { %v2752_v53 = vpop.f32.mrf.mxu3 }
 0x5b8   : > { %v2894_v7 = vadd.f32 %v5008_v22, %v2858_v44 }
 0x5b9   : > { %v2169_v6 = vpop.f32.mrf.mxu2  ;;  %v2623_v43 = vpop.f32.mrf.mxu1 }
 0x5ba   : > { %v2926_v24 = vmax.f32 %v2894_v7, 0.0  ;;  %v2240_v10 = vadd.f32 %v2169_v6, %v4497_v0 }
 0x5bb   : > { %v2040_v32 = vpop.f32.mrf.mxu0 }
 0x5bc   : > { %2958 = vst [vmem:[%s5016_s21 + $0x28] sm:$0xff] %v2926_v24  ;;  %v2823_v56 = vadd.f32 %v2752_v53, %v2240_v10 }
 0x5be   : > { %v2859_v4 = vmul.f32 %v5002_v13, %v2823_v56  ;;  %v1048_v56 = vadd.f32 %v4471_v19, %v4453_v21 }
 0x5bf   : > { %v2754_v5 = vpop.f32.mrf.mxu3 }
 0x5c0   : > { %v2895_v11 = vadd.f32 %v5008_v22, %v2859_v4 }
 0x5c1   : > { %v2171_v26 = vpop.f32.mrf.mxu2  ;;  %v2626_v55 = vpop.f32.mrf.mxu1 }
 0x5c2   : > { %v2927_v58 = vmax.f32 %v2895_v11, 0.0  ;;  %v2241_v46 = vadd.f32 %v2171_v26, %v1658_v63  ;;  %v2659_v20 = vpack.c.bf16 %v2626_v55, %v2623_v43  ;;  %v1662_v63 = vadd.f32 %v4551_v12, %v1048_v56 }
 0x5c3   : > { %v2043_v59 = vpop.f32.mrf.mxu0 }
 0x5c4   : > { %2959 = vst [vmem:[%s5016_s21 + $0x30] sm:$0xff] %v2927_v58  ;;  %v2076_v0 = vpack.c.bf16 %v2043_v59, %v2040_v32  ;;  %v2824_v61 = vadd.f32 %v2754_v5, %v2241_v46  ;;  %3488 = vmatmul.msk.bf16.gmra.mxu3 %vm819_vm2, %v2659_v20 }
 0x5c6   : > { %v2860_v37 = vmul.f32 %v5002_v13, %v2824_v61  ;;  %3375 = vmatmul.msk.bf16.gmra.mxu2 %vm819_vm2, %v2076_v0 }
 0x5c7   : > { %v2757_v60 = vpop.f32.mrf.mxu3 }
 0x5c8   : > { %v2896_v39 = vadd.f32 %v5008_v22, %v2860_v37 }
 0x5c9   : > { %v2174_v38 = vpop.f32.mrf.mxu2  ;;  %v2629_v14 = vpop.f32.mrf.mxu1 }
 0x5ca   : > { %v2928_v57 = vmax.f32 %v2896_v39, 0.0  ;;  %v2242_v15 = vadd.f32 %v2174_v38, %v4523_v45 }
 0x5cb   : > { %v2046_v18 = vpop.f32.mrf.mxu0 }
 0x5cc   : > { %2960 = vst [vmem:[%s5016_s21 + $0x38] sm:$0xff] %v2928_v57  ;;  %v2825_v42 = vadd.f32 %v2757_v60, %v2242_v15  ;;  %v1053_v57 = vadd.f32 %v4499_v2, %v4473_v62 }
 0x5ce   : > { %v2861_v17 = vmul.f32 %v5002_v13, %v2825_v42  ;;  %v1664_v42 = vadd.f32 %v4576_v3, %v1053_v57 }
 0x5cf   : > { %v2759_v34 = vpop.f32.mrf.mxu3 }
 0x5d0   : > { %v2897_v27 = vadd.f32 %v5008_v22, %v2861_v17 }
 0x5d1   : > { %v2176_v9 = vpop.f32.mrf.mxu2  ;;  %v2632_v35 = vpop.f32.mrf.mxu1 }
 0x5d2   : > { %v2929_v28 = vmax.f32 %v2897_v27, 0.0  ;;  %v2243_v1 = vadd.f32 %v2176_v9, %v1660_v50  ;;  %v2660_v41 = vpack.c.bf16 %v2632_v35, %v2629_v14 }
 0x5d3   : > { %v2049_v45 = vpop.f32.mrf.mxu0 }
 0x5d4   : > { %2961 = vst [vmem:[%s5016_s21 + $0x40] sm:$0xff] %v2929_v28  ;;  %v2077_v44 = vpack.c.bf16 %v2049_v45, %v2046_v18  ;;  %v2826_v53 = vadd.f32 %v2759_v34, %v2243_v1  ;;  %3489 = vmatmul.msk.bf16.gmra.mxu3 %vm819_vm2, %v2660_v41 }
 0x5d6   : > { %v2862_v47 = vmul.f32 %v5002_v13, %v2826_v53  ;;  %3376 = vmatmul.msk.bf16.gmra.mxu2 %vm819_vm2, %v2077_v44  ;;  %v1058_v53 = vadd.f32 %v4529_v16, %v4491_v33 }
 0x5d7   : > { %v2762_v51 = vpop.f32.mrf.mxu3 }
 0x5d8   : > { %v2898_v25 = vadd.f32 %v5008_v22, %v2862_v47 }
 0x5d9   : > { %v2179_v7 = vpop.f32.mrf.mxu2  ;;  %v2635_v6 = vpop.f32.mrf.mxu1 }
 0x5da   : > { %v2930_v43 = vmax.f32 %v2898_v25, 0.0  ;;  %v2244_v24 = vadd.f32 %v2179_v7, %v4545_v30  ;;  %v1666_v25 = vadd.f32 %v4600_v31, %v1058_v53  ;;  %v1063_v31 = vadd.f32 %v4559_v54, %v4516_v29 }
 0x5db   : > { %v2052_v10 = vpop.f32.mrf.mxu0 }
 0x5dc   : > { %2962 = vst [vmem:[%s5016_s21 + $0x48] sm:$0xff] %v2930_v43  ;;  %v2827_v32 = vadd.f32 %v2762_v51, %v2244_v24 }
 0x5de   : > { %v2863_v4 = vmul.f32 %v5002_v13, %v2827_v32 }
 0x5df   : > { %v2764_v5 = vpop.f32.mrf.mxu3 }
 0x5e0   : > { %v2899_v11 = vadd.f32 %v5008_v22, %v2863_v4 }
 0x5e1   : > { %v2181_v26 = vpop.f32.mrf.mxu2  ;;  %v2638_v55 = vpop.f32.mrf.mxu1 }
 0x5e2   : > { %v2931_v58 = vmax.f32 %v2899_v11, 0.0  ;;  %v2245_v46 = vadd.f32 %v2181_v26, %v1662_v63  ;;  %v2661_v20 = vpack.c.bf16 %v2638_v55, %v2635_v6  ;;  %v1668_v26 = vadd.f32 %v4620_v52, %v1063_v31  ;;  %v5276_v52 = vld [vmem:[#allocation7_spill] sm:$0xff] }
 0x5e3   : > { %v2055_v30 = vpop.f32.mrf.mxu0 }
 0x5e4   : > { %2963 = vst [vmem:[%s5016_s21 + $0x50] sm:$0xff] %v2931_v58  ;;  %v2078_v59 = vpack.c.bf16 %v2055_v30, %v2052_v10  ;;  %v2828_v0 = vadd.f32 %v2764_v5, %v2245_v46  ;;  %3490 = vmatmul.msk.bf16.gmra.mxu3 %vm819_vm2, %v2661_v20 }
 0x5e6   : > { %v2864_v21 = vmul.f32 %v5002_v13, %v2828_v0  ;;  %3377 = vmatmul.msk.bf16.gmra.mxu2 %vm819_vm2, %v2078_v59 }
 0x5e7   : > { %v2767_v19 = vpop.f32.mrf.mxu3 }
 0x5e8   : > { %v2900_v12 = vadd.f32 %v5008_v22, %v2864_v21 }
 0x5e9   : > { %v2184_v61 = vpop.f32.mrf.mxu2  ;;  %v2641_v37 = vpop.f32.mrf.mxu1 }
 0x5ea   : > { %v2932_v60 = vmax.f32 %v2900_v12, 0.0  ;;  %v2246_v39 = vadd.f32 %v2184_v61, %v4571_v23  ;;  %v1068_v12 = vadd.f32 %v5276_v52, %v4539_v48 }
 0x5eb   : > { %v2058_v38 = vpop.f32.mrf.mxu0 }
 0x5ec   : > { %2964 = vst [vmem:[%s5016_s21 + $0x58] sm:$0xff] %v2932_v60  ;;  %v2829_v14 = vadd.f32 %v2767_v19, %v2246_v39  ;;  %v5277_v60 = vld [vmem:[#allocation17_spill] sm:$0xff] }
 0x5ed   : > { %v1670_v39 = vadd.f32 %v5277_v60, %v1068_v12 }
 0x5ee   : > { %v2865_v15 = vmul.f32 %v5002_v13, %v2829_v14 }
 0x5ef   : > { %v2769_v18 = vpop.f32.mrf.mxu3 }
 0x5f0   : > { %v2901_v40 = vadd.f32 %v5008_v22, %v2865_v15 }
 0x5f1   : > { %v2186_v17 = vpop.f32.mrf.mxu2  ;;  %v2644_v34 = vpop.f32.mrf.mxu1 }
 0x5f2   : > { %v2933_v50 = vmax.f32 %v2901_v40, 0.0  ;;  %v2247_v27 = vadd.f32 %v2186_v17, %v1664_v42  ;;  %v2662_v9 = vpack.c.bf16 %v2644_v34, %v2641_v37  ;;  %v5278_v34 = vld [vmem:[#allocation20_spill] sm:$0xff] }
 0x5f3   : > { %v2061_v23 = vpop.f32.mrf.mxu0 }
 0x5f4   : > { %2965 = vst [vmem:[%s5016_s21 + $0x60] sm:$0xff] %v2933_v50  ;;  %v2079_v35 = vpack.c.bf16 %v2061_v23, %v2058_v38  ;;  %v2830_v28 = vadd.f32 %v2769_v18, %v2247_v27  ;;  %3491 = vmatmul.msk.bf16.gmra.mxu3 %vm819_vm2, %v2662_v9  ;;  %v5279_v9 = vld [vmem:[#allocation5_spill] sm:$0xff]  ;;  %v5280_v23 = vld [vmem:[#allocation11_spill] sm:$0xff] }
 0x5f6   : > { %v2866_v62 = vmul.f32 %v5002_v13, %v2830_v28  ;;  %3378 = vmatmul.msk.bf16.gmra.mxu2 %vm819_vm2, %v2079_v35  ;;  %v1073_v35 = vadd.f32 %v5280_v23, %v5279_v9 }
 0x5f7   : > { %v2772_v2 = vpop.f32.mrf.mxu3 }
 0x5f8   : > { %v2902_v3 = vadd.f32 %v5008_v22, %v2866_v62 }
 0x5f9   : > { %v2189_v1 = vpop.f32.mrf.mxu2 }
 0x5fa   : > { %v2934_v41 = vmax.f32 %v2902_v3, 0.0  ;;  %v2248_v45 = vadd.f32 %v2189_v1, %v4596_v36 }
 0x5fc   : > { %2966 = vst [vmem:[%s5016_s21 + $0x68] sm:$0xff] %v2934_v41  ;;  %v2831_v44 = vadd.f32 %v2772_v2, %v2248_v45  ;;  %v5281_v2 = vld [vmem:[#allocation30_spill] sm:$0xff] }
 0x5fd   : > { %v1672_v3 = vadd.f32 %v5281_v2, %v1073_v35 }
 0x5fe   : > { %v2867_v47 = vmul.f32 %v5002_v13, %v2831_v44 }
 0x5ff   : > { %v2774_v51 = vpop.f32.mrf.mxu3 }
 0x600   : > { %v2903_v7 = vadd.f32 %v5008_v22, %v2867_v47  ;;  %v5282_v47 = vld [vmem:[#allocation6_spill] sm:$0xff] }
 0x601   : > { %v2191_v6 = vpop.f32.mrf.mxu2 }
 0x602   : > { %v2935_v43 = vmax.f32 %v2903_v7, 0.0  ;;  %v2249_v24 = vadd.f32 %v2191_v6, %v1666_v25 }
 0x604   : > { %2967 = vst [vmem:[%s5016_s21 + $0x70] sm:$0xff] %v2935_v43  ;;  %v2832_v10 = vadd.f32 %v2774_v51, %v2249_v24  ;;  %v5283_v51 = vld [vmem:[#allocation13_spill] sm:$0xff]  ;;  %v5284_v43 = vld [vmem:[#allocation31_spill] sm:$0xff] }
 0x605   : > { %v1076_v25 = vadd.f32 %v5283_v51, %v5282_v47 }
 0x606   : > { %v2868_v36 = vmul.f32 %v5002_v13, %v2832_v10 }
 0x607   : > { %v2777_v32 = vpop.f32.mrf.mxu3  ;;  %v1673_v24 = vadd.f32 %v5284_v43, %v1076_v25 }
 0x608   : > { %v2904_v56 = vadd.f32 %v5008_v22, %v2868_v36 }
 0x609   : > { %v2194_v33 = vpop.f32.mrf.mxu2 }
 0x60a   : > { %v2936_v16 = vmax.f32 %v2904_v56, 0.0  ;;  %v2250_v4 = vadd.f32 %v2194_v33, %v4614_v49 }
 0x60c   : > { %2968 = vst [vmem:[%s5016_s21 + $0x78] sm:$0xff] %v2936_v16  ;;  %v2833_v5 = vadd.f32 %v2777_v32, %v2250_v4  ;;  %v5285_v16 = vld [vmem:[#allocation8_spill] sm:$0xff]  ;;  %v5286_v4 = vld [vmem:[#allocation15_spill] sm:$0xff] }
 0x60e   : > { %v2869_v63 = vmul.f32 %v5002_v13, %v2833_v5  ;;  %v1078_v5 = vadd.f32 %v5286_v4, %v5285_v16 }
 0x60f   : > { %v2779_v11 = vpop.f32.mrf.mxu3 }
 0x610   : > { %v2905_v55 = vadd.f32 %v5008_v22, %v2869_v63 }
 0x611   : > { %v2196_v58 = vpop.f32.mrf.mxu2 }
 0x612   : > { %v2937_v46 = vmax.f32 %v2905_v55, 0.0  ;;  %v2251_v20 = vadd.f32 %v2196_v58, %v1668_v26 }
 0x614   : > { %2969 = vst [vmem:[%s5016_s21 + $0x80] sm:$0xff] %v2937_v46  ;;  %v2834_v30 = vadd.f32 %v2779_v11, %v2251_v20  ;;  %v5287_v11 = vld [vmem:[#allocation32_spill] sm:$0xff] }
 0x615   : > { %v1674_v26 = vadd.f32 %v5287_v11, %v1078_v5 }
 0x616   : > { %v2870_v49 = vmul.f32 %v5002_v13, %v2834_v30 }
 0x617   : > { %v2782_v59 = vpop.f32.mrf.mxu3 }
 0x618   : > { %v2906_v0 = vadd.f32 %v5008_v22, %v2870_v49  ;;  %v5288_v49 = vld [vmem:[#allocation9_spill] sm:$0xff] }
 0x619   : > { %v2199_v29 = vpop.f32.mrf.mxu2 }
 0x61a   : > { %v2938_v54 = vmax.f32 %v2906_v0, 0.0  ;;  %v2252_v21 = vadd.f32 %v2199_v29, %v4633_v8 }
 0x61c   : > { %2970 = vst [vmem:[%s5016_s21 + $0x88] sm:$0xff] %v2938_v54  ;;  %v2835_v19 = vadd.f32 %v2782_v59, %v2252_v21  ;;  %v5289_v59 = vld [vmem:[#allocation19_spill] sm:$0xff]  ;;  %v5290_v21 = vld [vmem:[#allocation33_spill] sm:$0xff] }
 0x61d   : > { %v1081_v0 = vadd.f32 %v5289_v59, %v5288_v49 }
 0x61e   : > { %v2871_v61 = vmul.f32 %v5002_v13, %v2835_v19 }
 0x61f   : > { %v2784_v37 = vpop.f32.mrf.mxu3  ;;  %v1675_v19 = vadd.f32 %v5290_v21, %v1081_v0 }
 0x620   : > { %v2907_v38 = vadd.f32 %v5008_v22, %v2871_v61 }
 0x621   : > { %v2201_v14 = vpop.f32.mrf.mxu2 }
 0x622   : > { %v2939_v57 = vmax.f32 %v2907_v38, 0.0  ;;  %v2253_v15 = vadd.f32 %v2201_v14, %v1670_v39  ;;  %v5291_v39 = vld [vmem:[#allocation10_spill] sm:$0xff] }
 0x623   : > { %v5292_v38 = vld [vmem:[#allocation22_spill] sm:$0xff] }
 0x624   : > { %2971 = vst [vmem:[%s5016_s21 + $0x90] sm:$0xff] %v2939_v57  ;;  %v2836_v18 = vadd.f32 %v2784_v37, %v2253_v15  ;;  %v1083_v14 = vadd.f32 %v5292_v38, %v5291_v39 }
 0x626   : > { %v2872_v8 = vmul.f32 %v5002_v13, %v2836_v18  ;;  %v5293_v18 = vld [vmem:[#allocation34_spill] sm:$0xff] }
 0x627   : > { %v2787_v42 = vpop.f32.mrf.mxu3 }
 0x628   : > { %v2908_v40 = vadd.f32 %v5008_v22, %v2872_v8  ;;  %v1676_v8 = vadd.f32 %v5293_v18, %v1083_v14  ;;  %v5308_v14 = vld [vmem:[#allocation39_spill] sm:$0xff] }
 0x629   : > { %v2204_v48 = vpop.f32.mrf.mxu2 }
 0x62a   : > { %v2940_v17 = vmax.f32 %v2908_v40, 0.0  ;;  %v2254_v50 = vadd.f32 %v2204_v48, %v5278_v34 }
 0x62c   : > { %2972 = vst [vmem:[%s5016_s21 + $0x98] sm:$0xff] %v2940_v17  ;;  %v2837_v27 = vadd.f32 %v2787_v42, %v2254_v50  ;;  %v5294_v50 = vld [vmem:[#allocation12_spill] sm:$0xff] }
 0x62e   : > { %v2873_v28 = vmul.f32 %v5002_v13, %v2837_v27  ;;  %v5295_v27 = vld [vmem:[#allocation24_spill] sm:$0xff] }
 0x62f   : > { %v2789_v62 = vpop.f32.mrf.mxu3  ;;  %v1086_v9 = vadd.f32 %v5295_v27, %v5294_v50 }
 0x630   : > { %v2909_v1 = vadd.f32 %v5008_v22, %v2873_v28  ;;  %v5296_v28 = vld [vmem:[#allocation35_spill] sm:$0xff] }
 0x631   : > { %v2206_v41 = vpop.f32.mrf.mxu2 }
 0x632   : > { %v2941_v45 = vmax.f32 %v2909_v1, 0.0  ;;  %v2255_v44 = vadd.f32 %v2206_v41, %v1672_v3 }
 0x634   : > { %2973 = vst [vmem:[%s5016_s21 + $0xa0] sm:$0xff] %v2941_v45  ;;  %v2838_v53 = vadd.f32 %v2789_v62, %v2255_v44  ;;  %v1677_v62 = vadd.f32 %v5296_v28, %v1086_v9  ;;  %v5297_v44 = vld [vmem:[#allocation14_spill] sm:$0xff]  ;;  %v5311_v9 = vld [vmem:[#allocation40_spill] sm:$0xff] }
 0x636   : > { %v2874_v7 = vmul.f32 %v5002_v13, %v2838_v53  ;;  %v5298_v53 = vld [vmem:[#allocation25_spill] sm:$0xff] }
 0x637   : > { %v2792_v6 = vpop.f32.mrf.mxu3  ;;  %v1088_v47 = vadd.f32 %v5298_v53, %v5297_v44 }
 0x638   : > { %v2910_v10 = vadd.f32 %v5008_v22, %v2874_v7  ;;  %v5299_v7 = vld [vmem:[#allocation36_spill] sm:$0xff] }
 0x639   : > { %v2209_v36 = vpop.f32.mrf.mxu2 }
 0x63a   : > { %v2942_v32 = vmax.f32 %v2910_v10, 0.0  ;;  %v2256_v56 = vadd.f32 %v2209_v36, %v1673_v24 }
 0x63c   : > { %2974 = vst [vmem:[%s5016_s21 + $0xa8] sm:$0xff] %v2942_v32  ;;  %v2839_v33 = vadd.f32 %v2792_v6, %v2256_v56  ;;  %v1678_v6 = vadd.f32 %v5299_v7, %v1088_v47  ;;  %v5300_v56 = vld [vmem:[#allocation16_spill] sm:$0xff] }
 0x63e   : > { %v2875_v31 = vmul.f32 %v5002_v13, %v2839_v33  ;;  %v5301_v33 = vld [vmem:[#allocation26_spill] sm:$0xff] }
 0x63f   : > { %v2794_v63 = vpop.f32.mrf.mxu3  ;;  %v1091_v16 = vadd.f32 %v5301_v33, %v5300_v56 }
 0x640   : > { %v2911_v55 = vadd.f32 %v5008_v22, %v2875_v31  ;;  %v5302_v31 = vld [vmem:[#allocation37_spill] sm:$0xff] }
 0x641   : > { %v2211_v58 = vpop.f32.mrf.mxu2 }
 0x642   : > { %v2943_v46 = vmax.f32 %v2911_v55, 0.0  ;;  %v2257_v20 = vadd.f32 %v2211_v58, %v1674_v26 }
 0x644   : > { %2975 = vst [vmem:[%s5016_s21 + $0xb0] sm:$0xff] %v2943_v46  ;;  %v2840_v30 = vadd.f32 %v2794_v63, %v2257_v20  ;;  %v1679_v63 = vadd.f32 %v5302_v31, %v1091_v16  ;;  %v5303_v20 = vld [vmem:[#allocation18_spill] sm:$0xff] }
 0x646   : > { %v2876_v29 = vmul.f32 %v5002_v13, %v2840_v30  ;;  %v5304_v30 = vld [vmem:[#allocation27_spill] sm:$0xff] }
 0x647   : > { %v2797_v54 = vpop.f32.mrf.mxu3  ;;  %v1093_v49 = vadd.f32 %v5304_v30, %v5303_v20 }
 0x648   : > { %v2912_v52 = vadd.f32 %v5008_v22, %v2876_v29  ;;  %v5305_v29 = vld [vmem:[#allocation38_spill] sm:$0xff] }
 0x649   : > { %v2214_v12 = vpop.f32.mrf.mxu2 }
 0x64a   : > { %v2944_v61 = vmax.f32 %v2912_v52, 0.0  ;;  %v2258_v37 = vadd.f32 %v2214_v12, %v1675_v19 }
 0x64c   : > { %2976 = vst [vmem:[%s5016_s21 + $0xb8] sm:$0xff] %v2944_v61  ;;  %v2841_v60 = vadd.f32 %v2797_v54, %v2258_v37  ;;  %v1680_v54 = vadd.f32 %v5305_v29, %v1093_v49  ;;  %v5306_v37 = vld [vmem:[#allocation21_spill] sm:$0xff] }
 0x64e   : > { %v2877_v57 = vmul.f32 %v5002_v13, %v2841_v60  ;;  %v5307_v60 = vld [vmem:[#allocation28_spill] sm:$0xff] }
 0x64f   : > { %v2799_v15 = vpop.f32.mrf.mxu3  ;;  %v1096_v39 = vadd.f32 %v5307_v60, %v5306_v37 }
 0x650   : > { %v2913_v42 = vadd.f32 %v5008_v22, %v2877_v57 }
 0x651   : > { %v2216_v40 = vpop.f32.mrf.mxu2  ;;  %v1681_v57 = vadd.f32 %v5308_v14, %v1096_v39 }
 0x652   : > { %v2945_v48 = vmax.f32 %v2913_v42, 0.0  ;;  %v2259_v17 = vadd.f32 %v2216_v40, %v1676_v8 }
 0x654   : > { %2977 = vst [vmem:[%s5016_s21 + $0xc0] sm:$0xff] %v2945_v48  ;;  %v2842_v34 = vadd.f32 %v2799_v15, %v2259_v17  ;;  %v5309_v17 = vld [vmem:[#allocation23_spill] sm:$0xff] }
 0x656   : > { %v2878_v23 = vmul.f32 %v5002_v13, %v2842_v34  ;;  %v5310_v34 = vld [vmem:[#allocation29_spill] sm:$0xff] }
 0x657   : > { %v2802_v35 = vpop.f32.mrf.mxu3  ;;  %v1098_v50 = vadd.f32 %v5310_v34, %v5309_v17 }
 0x658   : > { %v2914_v2 = vadd.f32 %v5008_v22, %v2878_v23 }
 0x659   : > { %v2219_v3 = vpop.f32.mrf.mxu2  ;;  %v1682_v23 = vadd.f32 %v5311_v9, %v1098_v50 }
 0x65a   : > { %v2946_v1 = vmax.f32 %v2914_v2, 0.0  ;;  %v2260_v41 = vadd.f32 %v2219_v3, %v1677_v62 }
 0x65c   : > { %2978 = vst [vmem:[%s5016_s21 + $0xc8] sm:$0xff] %v2946_v1  ;;  %v2843_v45 = vadd.f32 %v2802_v35, %v2260_v41 }
 0x65e   : > { %v2879_v51 = vmul.f32 %v5002_v13, %v2843_v45 }
 0x65f   : > { %v2804_v25 = vpop.f32.mrf.mxu3 }
 0x660   : > { %v2915_v43 = vadd.f32 %v5008_v22, %v2879_v51 }
 0x661   : > { %v2221_v24 = vpop.f32.mrf.mxu2 }
 0x662   : > { %v2947_v10 = vmax.f32 %v2915_v43, 0.0  ;;  %v2261_v36 = vadd.f32 %v2221_v24, %v1678_v6 }
 0x664   : > { %2979 = vst [vmem:[%s5016_s21 + $0xd0] sm:$0xff] %v2947_v10  ;;  %v2844_v32 = vadd.f32 %v2804_v25, %v2261_v36 }
 0x666   : > { %v2880_v4 = vmul.f32 %v5002_v13, %v2844_v32 }
 0x667   : > { %v2807_v5 = vpop.f32.mrf.mxu3 }
 0x668   : > { %v2916_v11 = vadd.f32 %v5008_v22, %v2880_v4 }
 0x669   : > { %v2224_v26 = vpop.f32.mrf.mxu2 }
 0x66a   : > { %v2948_v55 = vmax.f32 %v2916_v11, 0.0  ;;  %v2262_v58 = vadd.f32 %v2224_v26, %v1679_v63 }
 0x66c   : > { %2980 = vst [vmem:[%s5016_s21 + $0xd8] sm:$0xff] %v2948_v55  ;;  %v2845_v46 = vadd.f32 %v2807_v5, %v2262_v58 }
 0x66e   : > { %v2881_v59 = vmul.f32 %v5002_v13, %v2845_v46 }
 0x66f   : > { %v2809_v0 = vpop.f32.mrf.mxu3 }
 0x670   : > { %v2917_v21 = vadd.f32 %v5008_v22, %v2881_v59 }
 0x671   : > { %v2226_v19 = vpop.f32.mrf.mxu2 }
 0x672   : > { %v2949_v52 = vmax.f32 %v2917_v21, 0.0  ;;  %v2263_v12 = vadd.f32 %v2226_v19, %v1680_v54 }
 0x674   : > { %2981 = vst [vmem:[%s5016_s21 + $0xe0] sm:$0xff] %v2949_v52  ;;  %v2846_v61 = vadd.f32 %v2809_v0, %v2263_v12 }
 0x676   : > { %v2882_v38 = vmul.f32 %v5002_v13, %v2846_v61 }
 0x677   : > { %v2812_v8 = vpop.f32.mrf.mxu3 }
 0x678   : > { %v2918_v15 = vadd.f32 %v5008_v22, %v2882_v38 }
 0x679   : > { %v2229_v18 = vpop.f32.mrf.mxu2 }
 0x67a   : > { %v2950_v42 = vmax.f32 %v2918_v15, 0.0  ;;  %v2264_v40 = vadd.f32 %v2229_v18, %v1681_v57 }
 0x67c   : > { %2982 = vst [vmem:[%s5016_s21 + $0xe8] sm:$0xff] %v2950_v42  ;;  %v2847_v48 = vadd.f32 %v2812_v8, %v2264_v40 }
 0x67e   : > { %v2883_v27 = vmul.f32 %v5002_v13, %v2847_v48 }
 0x67f   : > { %v2814_v3 = vpop.f32.mrf.mxu3 }
 0x680   : > { %v2919_v35 = vadd.f32 %v5008_v22, %v2883_v27 }
 0x681   : > { %v2231_v28 = vpop.f32.mrf.mxu2 }
 0x682   : > { %v2951_v62 = vmax.f32 %v2919_v35, 0.0  ;;  %v2265_v2 = vadd.f32 %v2231_v28, %v1682_v23 }
 0x684   : > { %2983 = vst [vmem:[%s5016_s21 + $0xf0] sm:$0xff] %v2951_v62  ;;  %v2848_v1 = vadd.f32 %v2814_v3, %v2265_v2 }
 0x686   : > { %v2884_v41 = vmul.f32 %v5002_v13, %v2848_v1 }
 0x688   : > { %v2920_v45 = vadd.f32 %v5008_v22, %v2884_v41 }
 0x68a   : > { %v2952_v44 = vmax.f32 %v2920_v45, 0.0 }
 0x68c   : > { %2984 = vst [vmem:[%s5016_s21 + $0xf8] sm:$0xff] %v2952_v44 }
 0x68d   : > { %3608 = shalt.err (!%p3605_p3)
}
 0x68e   : > { %s3645_s11 = smov 128   ;;  %s3646_s21 = smov 8  }
 0x68f   : > { %3522 = dma.vmem_to_hbm [thread:$0]  (%p3740_p5), %s2999_s29, 4096, %s3001_s30, %s2986_s17, %s3645_s11, %s3645_s11, %s3646_s21  }
 0x690 PF: > { %p3528_p4 = scmp.ge.s32.totalorder %s3643_s16, 2  ;;  %s3015_s20 = sand.u32 1, %s3631_s13  }
 0x691   : > { %s3016_s25 = scalar_lea.sflag [#allocation3], %s3015_s20 }
 0x692   : > { %p3525_p7 = pnand %p3528_p4, %p3744_p6 }
 0x694   : > { %p3526_p8 = pneg %p3525_p7 }
 0x696   : > { %3626 = dma.done.wait (%p3526_p8), %s3016_s25, 4096  }
 0x697   : > { %3628 = vsyncadd (%p3526_p8), %s3016_s25, 4294963200  ;;  %p20_p9 = scmp.ge.s32.totalorder %s3727_s19, 4   ;;  %s5312_s13 = smov %s3635_s14 }
 0x698   : > { %s5313_s14 = smov %s3639_s15  ;;  %s5314_s15 = smov %s3738_s22 }
 0x699   : > { %s5315_s16 = smov %s3727_s19  ;;  %22 = sbr.rel (!%p20_p9) target bundleno = 3 (0x3), region = 113 }
 0x69e   :  { %3022 = vsyncpa [#allocation3], 1 }
 0x69f   :  { %3024 = vsyncpa [#allocation3 + $0x1], 1 }

</bundles_post_ra>
